<compile_context>
chip_gen: v7x
topology: tpu7x:2x2x1
jax: 0.10.0
libtpu: 0.0.40
codegen_flags: <defaults>
</compile_context>

<pallas_src>
import numpy as np

import jax
import jax.numpy as jnp
from jax import lax
from jax.experimental import pallas as pl
from jax.experimental.pallas import tpu as pltpu

EPS_PW = 1e-6     # PairwiseDistance eps (added to the difference)
EPS_CD = 1e-6     # CenterDistance / RadiusConstraint eps
EPS_DICE = 1e-8   # MaskedDiceLoss eps
ALPHA = 5.0       # RadiusConstraintLoss alpha
TEMP = 0.7        # ConsistencyLoss temperature

N_STATS = 21      # packed per-slice statistics (see kernel docstring)
OUT_LANES = 128   # lane-dense output row width


def _choose_tiles(Z, YX, slab_cap_bytes=1 << 20):
    """Pick (TZ, TYX): z-slices / flattened pixels processed per grid step.

    Budget: one (TZ, TYX) f32 slab <= ~1 MiB.  The total per-step working set
    (6 input maps double-buffered + ~15-20 live f32 intermediates) is ~28x a
    slab, i.e. ~28 MiB -- under the 48 MiB scoped-VMEM limit used below and
    safe on v7x's 64 MiB physical VMEM (v5e/v6e have 128 MiB).

    Constraints (f32 logits + bf16 labels/masks):
      * TZ  must be a multiple of 16 (bf16 sublane packing) or equal Z.
      * TYX must be a multiple of 128 or equal YX.
    """
    def fits(tz, tyx):
        return tz * tyx * 4 <= slab_cap_bytes

    if fits(Z, YX):
        return Z, YX
    # Prefer tiling z only (keeps whole slices lane-dense).
    tz_opts = [tz for tz in range(16, Z, 16) if Z % tz == 0]
    z_fit = [tz for tz in tz_opts if fits(tz, YX)]
    if z_fit:
        return max(z_fit), YX
    # Fall back to also tiling the lane (Y*X) axis.
    tz = min(tz_opts) if tz_opts else Z
    tyx_opts = [t for t in range(128, YX, 128) if YX % t == 0]
    yx_fit = [t for t in tyx_opts if fits(tz, t)]
    if yx_fit:
        return tz, max(yx_fit)
    return tz, (min(tyx_opts) if tyx_opts else YX)


def _make_fused_kernel(r_i0, r_i1, r_e0, r_e1, Z, TZ, TYX):
    """Fused per-(b, yx-block, z-block) kernel.

    Inputs  (blocks): logits (1,C,TZ,TYX) f32; labels/masks (1,C,TZ,TYX) bf16;
                      targets (1,TZ,4) = [ty_i, tx_i, ty_e, tx_e];
                      grid coords (2,TYX) = [gy; gx] (constant per yx block).
    Output  (block) : (1,1,TZ,128) per-slice partial stats, lanes 0..20 used:
        0 bce_sum  1 inter  2 sum(p*m)  3 sum(t*m)
        4..10  ICA: Sy Sx Sp lu_out ow_out lu_in ow_in
        11..17 ECA: Sy Sx Sp lu_out ow_out lu_in ow_in
        18 P0  19 P1  20 csis_sum
    Scratch: (1,TYX) carry of the previous slice's channel-0 softmax.
    """
    inv_T = 1.0 / TEMP
    inv_alpha = 1.0 / ALPHA

    def kernel(logit_ref, label_ref, mask_ref, tgt_ref, gyx_ref, out_ref,
               carry_ref):
        zb = pl.program_id(2)

        x0 = logit_ref[0, 0].astype(jnp.float32)     # (TZ, TYX)
        x1 = logit_ref[0, 1].astype(jnp.float32)
        t0 = label_ref[0, 0].astype(jnp.float32)
        t1 = label_ref[0, 1].astype(jnp.float32)
        m0 = mask_ref[0, 0].astype(jnp.float32)
        m1 = mask_ref[0, 1].astype(jnp.float32)
        tg = tgt_ref[0].astype(jnp.float32)          # (TZ, 4)

        def rowsum(v):                               # lane reduce -> (TZ, 1)
            return jnp.sum(v, axis=-1, keepdims=True)

        # ---- seg: BCEWithLogits(pos_weight=m) + sigmoid (shared exp(-|x|)) ---
        def bce_and_prob(x, t, m):
            e = jnp.exp(-jnp.abs(x))
            l1pe = jnp.log1p(e)
            log_sig = -(jnp.maximum(-x, 0.0) + l1pe)       # log sigmoid(x)
            log_1ms = -(jnp.maximum(x, 0.0) + l1pe)        # log(1 - sigmoid(x))
            bce = -(m * t * log_sig + (1.0 - t) * log_1ms)
            p = jnp.where(x >= 0.0, 1.0, e) / (1.0 + e)    # sigmoid(x)
            return bce, p

        bce0, p0 = bce_and_prob(x0, t0, m0)
        bce1, p1 = bce_and_prob(x1, t1, m1)
        bce_col = rowsum(bce0 + bce1)
        pm0, pm1 = p0 * m0, p1 * m1
        tm0, tm1 = t0 * m0, t1 * m1
        inter_col = rowsum(pm0 * tm0 + pm1 * tm1)
        psum_col = rowsum(pm0 + pm1)
        tsum_col = rowsum(tm0 + tm1)

        # ---- centerline distance maps (broadcasts hoisted once) --------------
        gy = jnp.broadcast_to(gyx_ref[0:1, :], (TZ, TYX))
        gx = jnp.broadcast_to(gyx_ref[1:2, :], (TZ, TYX))
        ty_i, tx_i = tg[:, 0:1], tg[:, 1:2]          # (TZ, 1)
        ty_e, tx_e = tg[:, 2:3], tg[:, 3:4]

        dyi = gy - ty_i + EPS_PW
        dxi = gx - tx_i + EPS_PW
        d_i = jnp.sqrt(dyi * dyi + dxi * dxi)
        dye = gy - ty_e + EPS_PW
        dxe = gx - tx_e + EPS_PW
        d_e = jnp.sqrt(dye * dye + dxe * dxe)

        # art_masks are swapped in the reference implementation.
        # TODO(synk): d2/radius binarization uses the OUTER radius (radius[1]).
        am_i = (d_e > r_e1).astype(jnp.float32)
        am_e = (d_i > r_i1).astype(jnp.float32)

        psum = p0 + p1
        not_p0 = 1.0 - p0
        not_p1 = 1.0 - p1

        def stat_cols(d, am, r0, r1):
            w = am * psum
            e0 = jnp.exp(1.0 - d * (1.0 / r0))       # shared by out & in terms
            e1 = jnp.exp(1.0 - d * (1.0 / r1))
            df0 = e0 - 1.0
            df1 = e1 - 1.0
            return [
                rowsum(w * gy),                                        # Sy
                rowsum(w * gx),                                        # Sx
                rowsum(w),                                             # Sp
                rowsum(jnp.maximum(-df0, 0.0) * am * p0) * inv_alpha,  # lu_out
                rowsum(jnp.maximum(-df1, 0.0) * am * p1) * inv_alpha,  # ow_out
                rowsum(jnp.maximum(df0, 0.0) * not_p0),                # lu_in
                rowsum(jnp.maximum(df1, 0.0) * not_p1),                # ow_in
            ]

        cols_i = stat_cols(d_i, am_i, r_i0, r_i1)
        cols_e = stat_cols(d_e, am_e, r_e0, r_e1)
        p0_col = rowsum(p0)
        p1_col = rowsum(p1)

        # ---- consistency: softmax over C=2 == sigmoid((x0 - x1)/T) -----------
        @pl.when(zb == 0)
        def _():
            # z = 0 is never an "orig" slice, so the carry value is unused at
            # the first block -- it just has to be finite.
            carry_ref[...] = jnp.full(carry_ref.shape, 0.5, carry_ref.dtype)

        u = (x0 - x1) * inv_T
        eu = jnp.exp(-jnp.abs(u))
        l1pu = jnp.log1p(eu)
        # F.binary_cross_entropy clamps each log at -100.
        l0 = jnp.maximum(-(jnp.maximum(-u, 0.0) + l1pu), -100.0)  # log softmax c0
        l1 = jnp.maximum(-(jnp.maximum(u, 0.0) + l1pu), -100.0)   # log softmax c1
        po0 = jnp.where(u >= 0.0, 1.0, eu) / (1.0 + eu)           # softmax c0

        # shift target = previous slice's softmax (row above within the block,
        # carried last-row of the previous z-block for row 0).  Channel 1 of
        # the target is exactly 1 - channel 0.
        ps0 = jnp.concatenate([carry_ref[0:1, :], po0[:TZ - 1, :]], axis=0)
        carry_ref[0:1, :] = po0[TZ - 1:TZ, :]

        # Both channels contribute identical BCE values (1 - po0 == po1), so
        # compute once and double.
        gz = lax.broadcasted_iota(jnp.int32, (TZ, 1), 0) + zb * TZ
        gate = jnp.logical_and(gz >= 1, gz <= Z - 2).astype(jnp.float32)
        csis_col = gate * (-2.0) * rowsum(ps0 * l0 + (1.0 - ps0) * l1)

        # ---- pack into a lane-dense (TZ, 128) row block -----------------------
        cols = ([bce_col, inter_col, psum_col, tsum_col]
                + cols_i + cols_e + [p0_col, p1_col, csis_col])
        pad = jnp.zeros((TZ, OUT_LANES - len(cols)), dtype=jnp.float32)
        out_ref[0, 0] = jnp.concatenate(cols + [pad], axis=-1)

    return kernel


def total_seg_loss(logits, labels, maskmats, centerlines, radiuses):
    B, C, Z, Y, X = logits.shape
    assert C == 2, "TotalSegLoss expects 2 channels (lumen, outer wall)"
    assert Z >= 3, "ConsistencyLoss needs at least 3 slices"
    YX = Y * X
    ld1, ld2, ld3 = 0.1, 1.0, 0.001

    r_i0, r_i1 = float(radiuses[0][0]), float(radiuses[0][1])
    r_e0, r_e1 = float(radiuses[1][0]), float(radiuses[1][1])

    # ---- centerline -> per-slice target coords (tiny; plain JAX glue) -------
    cl = centerlines[:, 0]                                    # (B, Z, Y, X)
    iy = jnp.arange(Y, dtype=jnp.int32)[:, None]
    ix = jnp.arange(X, dtype=jnp.int32)[None, :]
    tgts = []
    for v in (1, 2):
        m = (cl == v)
        cnt = m.sum(axis=(2, 3))
        ys = (m * iy).sum(axis=(2, 3))
        xs = (m * ix).sum(axis=(2, 3))
        coords = jnp.stack([ys, xs], axis=-1)                 # (B, Z, 2)
        tgts.append(jnp.where((cnt == 1)[..., None], coords, -1)
                    .astype(jnp.float32))
    tgt_i, tgt_e = tgts
    tgt_all = jnp.concatenate([tgt_i, tgt_e], axis=-1)        # (B, Z, 4)

    # flat (y*X + x) grid coordinates, passed once as a tiny constant input
    gy_flat = jnp.repeat(jnp.arange(Y, dtype=jnp.float32), X)
    gx_flat = jnp.tile(jnp.arange(X, dtype=jnp.float32), Y)
    grid_yx = jnp.stack([gy_flat, gx_flat], axis=0)           # (2, YX)

    # ---- single fused pass over logits / labels / maskmats ------------------
    TZ, TYX = _choose_tiles(Z, YX)
    n_zblk = Z // TZ
    n_yxblk = YX // TYX
    lg = logits.reshape(B, C, Z, YX).astype(jnp.float32)      # free collapse
    # labels / maskmats are 0/1 valued -> bf16 is exact and halves their HBM read
    lb = labels.reshape(B, C, Z, YX).astype(jnp.bfloat16)
    mk = maskmats.reshape(B, C, Z, YX).astype(jnp.bfloat16)

    kern = _make_fused_kernel(r_i0, r_i1, r_e0, r_e1, Z, TZ, TYX)
    data_spec = pl.BlockSpec((1, C, TZ, TYX),
                             lambda b, yxb, zb: (b, 0, zb, yxb))
    stats = pl.pallas_call(
        kern,
        out_shape=jax.ShapeDtypeStruct((B, n_yxblk, Z, OUT_LANES), jnp.float32),
        grid=(B, n_yxblk, n_zblk),
        in_specs=[
            data_spec, data_spec, data_spec,
            pl.BlockSpec((1, TZ, 4), lambda b, yxb, zb: (b, zb, 0)),
            pl.BlockSpec((2, TYX), lambda b, yxb, zb: (0, yxb)),
        ],
        out_specs=pl.BlockSpec((1, 1, TZ, OUT_LANES),
                               lambda b, yxb, zb: (b, yxb, zb, 0)),
        scratch_shapes=[pltpu.VMEM((1, TYX), jnp.float32)],
        compiler_params=pltpu.CompilerParams(
            dimension_semantics=("parallel", "parallel", "arbitrary"),
            vmem_limit_bytes=48 * 1024 * 1024),
    )(lg, lb, mk, tgt_all, grid_yx)

    stats = jnp.sum(stats, axis=1)            # reduce over Y*X tiles -> (B, Z, 128)

    # ---- loss_seg : MaskedDiceBCELoss ----------------------------------------
    n_elem = B * C * Z * Y * X
    bce_sum = jnp.sum(stats[:, :, 0])
    inter = jnp.sum(stats[:, :, 1])
    p_sum = jnp.sum(stats[:, :, 2])
    t_sum = jnp.sum(stats[:, :, 3])
    dice_score = (2.0 * inter + EPS_DICE) / (p_sum + t_sum + EPS_DICE)
    loss_seg = bce_sum / n_elem + (1.0 - dice_score)

    s_i = stats[:, :, 4:11]        # (B, Z, 7)  ICA stats
    s_e = stats[:, :, 11:18]       # (B, Z, 7)  ECA stats
    P0 = stats[:, :, 18]
    P1 = stats[:, :, 19]
    csis_sum = jnp.sum(stats[:, :, 20])

    # ---- loss_cent : CenterDistanceLoss --------------------------------------
    loss_cent = jnp.float32(0.0)
    for s, tgt in ((s_i, tgt_i), (s_e, tgt_e)):
        sy, sx, sp = s[..., 0], s[..., 1], s[..., 2]
        y_cnt = sy / (sp + EPS_CD)
        x_cnt = sx / (sp + EPS_CD)
        valid = (tgt[..., 0] != -1.0).astype(jnp.float32)
        l2 = jnp.sqrt((y_cnt - tgt[..., 0] + EPS_PW) ** 2
                      + (x_cnt - tgt[..., 1] + EPS_PW) ** 2)
        loss_cent = loss_cent + jnp.mean(l2 * valid)

    # ---- loss_cnst : RadiusConstraintLoss ------------------------------------
    loss_cnst = jnp.float32(0.0)
    for s, tgt, r0, r1 in ((s_i, tgt_i, r_i0, r_i1), (s_e, tgt_e, r_e0, r_e1)):
        lu_out, ow_out = s[..., 3], s[..., 4]
        lu_in, ow_in = s[..., 5], s[..., 6]
        valid = (tgt[..., 0] != -1.0).astype(jnp.float32)
        rc_out = valid * (lu_out / (P0 + EPS_CD) + ow_out / (P1 + EPS_CD))
        rc_in = valid * (lu_in / (r0 * r0 * np.pi) + ow_in / (r1 * r1 * np.pi))
        loss_cnst = loss_cnst + jnp.mean(rc_out) + jnp.mean(rc_in)

    # ---- loss_csis : ConsistencyLoss -----------------------------------------
    loss_csis = csis_sum / (B * C * (Z - 2) * Y * X)

    loss = ld1 * loss_cent + ld2 * loss_cnst + ld3 * loss_csis + loss_seg
    return loss, loss


if __name__ == "__main__":
    B, C, Z, Y, X = 2, 2, 8, 16, 16
    key = jax.random.PRNGKey(0)
    k1, k2, k3 = jax.random.split(key, 3)
    logits = jax.random.normal(k1, (B, C, Z, Y, X), dtype=jnp.float32)
    labels = (jax.random.uniform(k2, (B, C, Z, Y, X)) > 0.5).astype(jnp.float32)
    maskmats = (jax.random.uniform(k3, (B, C, Z, Y, X)) > 0.3).astype(jnp.float32)

    # deterministic synthetic centerlines: one ICA (=1) and one ECA (=2) pixel
    # per slice, plus a missing slice and an ambiguous (double-ICA) slice.
    cl = np.zeros((B, 1, Z, Y, X), dtype=np.int32)
    for b in range(B):
        for z in range(Z):
            if b == 0 and z == Z - 1:
                continue  # missing centerline -> target (-1, -1)
            cl[b, 0, z, (3 + z) % Y, (4 + b) % X] = 1
            cl[b, 0, z, (9 + z) % Y, (11 - b) % X] = 2
    cl[1, 0, 0, 0, 0] = 1  # second ICA pixel -> treated as missing (-1, -1)
    centerlines = jnp.asarray(cl)

    radiuses = np.array([[3.0, 6.0], [3.0, 6.0]], dtype=np.float32)

    loss_fn = jax.jit(
        lambda lgt, lbl, mmat, cln: total_seg_loss(lgt, lbl, mmat, cln, radiuses))
    loss, loss_dup = loss_fn(logits, labels, maskmats, centerlines)
    jax.block_until_ready(loss)
    assert np.isfinite(np.asarray(loss))
    print("KERNEL_OK")
</pallas_src>

<mosaic_0001>
module attributes {stable_mosaic.version = 11 : i64} {
  func.func @kernel(%arg0: i32, %arg1: i32, %arg2: i32, %arg3: memref<1x2x8x256xf32, #tpu.memory_space<vmem>>, %arg4: memref<1x2x8x256xbf16, #tpu.memory_space<vmem>>, %arg5: memref<1x2x8x256xbf16, #tpu.memory_space<vmem>>, %arg6: memref<1x8x4xf32, #tpu.memory_space<vmem>>, %arg7: memref<2x256xf32, #tpu.memory_space<vmem>>, %arg8: memref<1x1x8x128xf32, #tpu.memory_space<vmem>>, %arg9: memref<1x256xf32, #tpu.memory_space<vmem>>) attributes {dimension_semantics = [#tpu.dimension_semantics<parallel>, #tpu.dimension_semantics<parallel>, #tpu.dimension_semantics<arbitrary>], iteration_bounds = array<i64: 2, 1, 1>, scalar_prefetch = 0 : i64, scratch_operands = 1 : i64, tpu.core_type = #tpu.core_type<tc>, window_params = [{transform_indices = @transform_0, window_bounds = array<i64: 1, 2, 8, 256>}, {transform_indices = @transform_1, window_bounds = array<i64: 1, 2, 8, 256>}, {transform_indices = @transform_2, window_bounds = array<i64: 1, 2, 8, 256>}, {transform_indices = @transform_3, window_bounds = array<i64: 1, 8, 4>}, {transform_indices = @transform_4, window_bounds = array<i64: 2, 256>}, {transform_indices = @transform_5, window_bounds = array<i64: 1, 1, 8, 128>}]} {
    %c0 = arith.constant 0 : index
    %c0_0 = arith.constant 0 : index
    %c0_1 = arith.constant 0 : index
    %c0_2 = arith.constant 0 : index
    %0 = vector.load %arg3[%c0, %c0_0, %c0_1, %c0_2] : memref<1x2x8x256xf32, #tpu.memory_space<vmem>>, vector<1x1x8x256xf32>
    %1 = vector.shape_cast %0 : vector<1x1x8x256xf32> to vector<8x256xf32>
    %c0_3 = arith.constant 0 : index
    %c1 = arith.constant 1 : index
    %c0_4 = arith.constant 0 : index
    %c0_5 = arith.constant 0 : index
    %2 = vector.load %arg3[%c0_3, %c1, %c0_4, %c0_5] : memref<1x2x8x256xf32, #tpu.memory_space<vmem>>, vector<1x1x8x256xf32>
    %3 = vector.shape_cast %2 : vector<1x1x8x256xf32> to vector<8x256xf32>
    %c0_6 = arith.constant 0 : index
    %c0_7 = arith.constant 0 : index
    %c0_8 = arith.constant 0 : index
    %c0_9 = arith.constant 0 : index
    %4 = vector.load %arg4[%c0_6, %c0_7, %c0_8, %c0_9] : memref<1x2x8x256xbf16, #tpu.memory_space<vmem>>, vector<1x1x8x256xbf16>
    %5 = vector.shape_cast %4 : vector<1x1x8x256xbf16> to vector<8x256xbf16>
    %6 = arith.extf %5 : vector<8x256xbf16> to vector<8x256xf32>
    %c0_10 = arith.constant 0 : index
    %c1_11 = arith.constant 1 : index
    %c0_12 = arith.constant 0 : index
    %c0_13 = arith.constant 0 : index
    %7 = vector.load %arg4[%c0_10, %c1_11, %c0_12, %c0_13] : memref<1x2x8x256xbf16, #tpu.memory_space<vmem>>, vector<1x1x8x256xbf16>
    %8 = vector.shape_cast %7 : vector<1x1x8x256xbf16> to vector<8x256xbf16>
    %9 = arith.extf %8 : vector<8x256xbf16> to vector<8x256xf32>
    %c0_14 = arith.constant 0 : index
    %c0_15 = arith.constant 0 : index
    %c0_16 = arith.constant 0 : index
    %c0_17 = arith.constant 0 : index
    %10 = vector.load %arg5[%c0_14, %c0_15, %c0_16, %c0_17] : memref<1x2x8x256xbf16, #tpu.memory_space<vmem>>, vector<1x1x8x256xbf16>
    %11 = vector.shape_cast %10 : vector<1x1x8x256xbf16> to vector<8x256xbf16>
    %12 = arith.extf %11 : vector<8x256xbf16> to vector<8x256xf32>
    %c0_18 = arith.constant 0 : index
    %c1_19 = arith.constant 1 : index
    %c0_20 = arith.constant 0 : index
    %c0_21 = arith.constant 0 : index
    %13 = vector.load %arg5[%c0_18, %c1_19, %c0_20, %c0_21] : memref<1x2x8x256xbf16, #tpu.memory_space<vmem>>, vector<1x1x8x256xbf16>
    %14 = vector.shape_cast %13 : vector<1x1x8x256xbf16> to vector<8x256xbf16>
    %15 = arith.extf %14 : vector<8x256xbf16> to vector<8x256xf32>
    %c0_22 = arith.constant 0 : index
    %c0_23 = arith.constant 0 : index
    %c0_24 = arith.constant 0 : index
    %16 = vector.load %arg6[%c0_22, %c0_23, %c0_24] : memref<1x8x4xf32, #tpu.memory_space<vmem>>, vector<1x8x4xf32>
    %17 = vector.shape_cast %16 : vector<1x8x4xf32> to vector<8x4xf32>
    %18 = math.absf %1 : vector<8x256xf32>
    %cst = arith.constant 0.000000e+00 : f32
    %19 = vector.broadcast %cst : f32 to vector<8x256xf32>
    %20 = arith.subf %19, %18 : vector<8x256xf32>
    %21 = math.exp %20 : vector<8x256xf32>
    %22 = math.log1p %21 : vector<8x256xf32>
    %cst_25 = arith.constant 0.000000e+00 : f32
    %23 = vector.broadcast %cst_25 : f32 to vector<8x256xf32>
    %24 = arith.subf %23, %1 : vector<8x256xf32>
    %cst_26 = arith.constant 0.000000e+00 : f32
    %25 = vector.broadcast %cst_26 : f32 to vector<8x256xf32>
    %26 = arith.maximumf %24, %25 : vector<8x256xf32>
    %27 = arith.addf %26, %22 : vector<8x256xf32>
    %cst_27 = arith.constant 0.000000e+00 : f32
    %28 = vector.broadcast %cst_27 : f32 to vector<8x256xf32>
    %29 = arith.subf %28, %27 : vector<8x256xf32>
    %cst_28 = arith.constant 0.000000e+00 : f32
    %30 = vector.broadcast %cst_28 : f32 to vector<8x256xf32>
    %31 = arith.maximumf %1, %30 : vector<8x256xf32>
    %32 = arith.addf %31, %22 : vector<8x256xf32>
    %cst_29 = arith.constant 0.000000e+00 : f32
    %33 = vector.broadcast %cst_29 : f32 to vector<8x256xf32>
    %34 = arith.subf %33, %32 : vector<8x256xf32>
    %35 = arith.mulf %12, %6 : vector<8x256xf32>
    %36 = arith.mulf %35, %29 : vector<8x256xf32>
    %cst_30 = arith.constant 1.000000e+00 : f32
    %37 = vector.broadcast %cst_30 : f32 to vector<8x256xf32>
    %38 = arith.subf %37, %6 : vector<8x256xf32>
    %39 = arith.mulf %38, %34 : vector<8x256xf32>
    %40 = arith.addf %36, %39 : vector<8x256xf32>
    %cst_31 = arith.constant 0.000000e+00 : f32
    %41 = vector.broadcast %cst_31 : f32 to vector<8x256xf32>
    %42 = arith.subf %41, %40 : vector<8x256xf32>
    %cst_32 = arith.constant 0.000000e+00 : f32
    %43 = vector.broadcast %cst_32 : f32 to vector<8x256xf32>
    %44 = arith.cmpf oge, %1, %43 : vector<8x256xf32>
    %cst_33 = arith.constant 1.000000e+00 : f32
    %45 = vector.broadcast %cst_33 : f32 to vector<8x256xf32>
    %46 = arith.select %44, %45, %21 : vector<8x256xi1>, vector<8x256xf32>
    %cst_34 = arith.constant 1.000000e+00 : f32
    %47 = vector.broadcast %cst_34 : f32 to vector<8x256xf32>
    %48 = arith.addf %47, %21 : vector<8x256xf32>
    %49 = arith.divf %46, %48 : vector<8x256xf32>
    %50 = math.absf %3 : vector<8x256xf32>
    %cst_35 = arith.constant 0.000000e+00 : f32
    %51 = vector.broadcast %cst_35 : f32 to vector<8x256xf32>
    %52 = arith.subf %51, %50 : vector<8x256xf32>
    %53 = math.exp %52 : vector<8x256xf32>
    %54 = math.log1p %53 : vector<8x256xf32>
    %cst_36 = arith.constant 0.000000e+00 : f32
    %55 = vector.broadcast %cst_36 : f32 to vector<8x256xf32>
    %56 = arith.subf %55, %3 : vector<8x256xf32>
    %cst_37 = arith.constant 0.000000e+00 : f32
    %57 = vector.broadcast %cst_37 : f32 to vector<8x256xf32>
    %58 = arith.maximumf %56, %57 : vector<8x256xf32>
    %59 = arith.addf %58, %54 : vector<8x256xf32>
    %cst_38 = arith.constant 0.000000e+00 : f32
    %60 = vector.broadcast %cst_38 : f32 to vector<8x256xf32>
    %61 = arith.subf %60, %59 : vector<8x256xf32>
    %cst_39 = arith.constant 0.000000e+00 : f32
    %62 = vector.broadcast %cst_39 : f32 to vector<8x256xf32>
    %63 = arith.maximumf %3, %62 : vector<8x256xf32>
    %64 = arith.addf %63, %54 : vector<8x256xf32>
    %cst_40 = arith.constant 0.000000e+00 : f32
    %65 = vector.broadcast %cst_40 : f32 to vector<8x256xf32>
    %66 = arith.subf %65, %64 : vector<8x256xf32>
    %67 = arith.mulf %15, %9 : vector<8x256xf32>
    %68 = arith.mulf %67, %61 : vector<8x256xf32>
    %cst_41 = arith.constant 1.000000e+00 : f32
    %69 = vector.broadcast %cst_41 : f32 to vector<8x256xf32>
    %70 = arith.subf %69, %9 : vector<8x256xf32>
    %71 = arith.mulf %70, %66 : vector<8x256xf32>
    %72 = arith.addf %68, %71 : vector<8x256xf32>
    %cst_42 = arith.constant 0.000000e+00 : f32
    %73 = vector.broadcast %cst_42 : f32 to vector<8x256xf32>
    %74 = arith.subf %73, %72 : vector<8x256xf32>
    %cst_43 = arith.constant 0.000000e+00 : f32
    %75 = vector.broadcast %cst_43 : f32 to vector<8x256xf32>
    %76 = arith.cmpf oge, %3, %75 : vector<8x256xf32>
    %cst_44 = arith.constant 1.000000e+00 : f32
    %77 = vector.broadcast %cst_44 : f32 to vector<8x256xf32>
    %78 = arith.select %76, %77, %53 : vector<8x256xi1>, vector<8x256xf32>
    %cst_45 = arith.constant 1.000000e+00 : f32
    %79 = vector.broadcast %cst_45 : f32 to vector<8x256xf32>
    %80 = arith.addf %79, %53 : vector<8x256xf32>
    %81 = arith.divf %78, %80 : vector<8x256xf32>
    %82 = arith.addf %42, %74 : vector<8x256xf32>
    %cst_46 = arith.constant dense<0.000000e+00> : vector<8xf32>
    %83 = vector.multi_reduction <add>, %82, %cst_46 [1] : vector<8x256xf32> to vector<8xf32>
    %84 = vector.shape_cast %83 : vector<8xf32> to vector<8x1xf32>
    %85 = arith.mulf %49, %12 : vector<8x256xf32>
    %86 = arith.mulf %81, %15 : vector<8x256xf32>
    %87 = arith.mulf %6, %12 : vector<8x256xf32>
    %88 = arith.mulf %9, %15 : vector<8x256xf32>
    %89 = arith.mulf %85, %87 : vector<8x256xf32>
    %90 = arith.mulf %86, %88 : vector<8x256xf32>
    %91 = arith.addf %89, %90 : vector<8x256xf32>
    %cst_47 = arith.constant dense<0.000000e+00> : vector<8xf32>
    %92 = vector.multi_reduction <add>, %91, %cst_47 [1] : vector<8x256xf32> to vector<8xf32>
    %93 = vector.shape_cast %92 : vector<8xf32> to vector<8x1xf32>
    %94 = arith.addf %85, %86 : vector<8x256xf32>
    %cst_48 = arith.constant dense<0.000000e+00> : vector<8xf32>
    %95 = vector.multi_reduction <add>, %94, %cst_48 [1] : vector<8x256xf32> to vector<8xf32>
    %96 = vector.shape_cast %95 : vector<8xf32> to vector<8x1xf32>
    %97 = arith.addf %87, %88 : vector<8x256xf32>
    %cst_49 = arith.constant dense<0.000000e+00> : vector<8xf32>
    %98 = vector.multi_reduction <add>, %97, %cst_49 [1] : vector<8x256xf32> to vector<8xf32>
    %99 = vector.shape_cast %98 : vector<8xf32> to vector<8x1xf32>
    %c0_50 = arith.constant 0 : index
    %c0_51 = arith.constant 0 : index
    %100 = vector.load %arg7[%c0_50, %c0_51] : memref<2x256xf32, #tpu.memory_space<vmem>>, vector<1x256xf32>
    %101 = vector.shape_cast %100 : vector<1x256xf32> to vector<1x256xf32>
    %102 = vector.broadcast %101 : vector<1x256xf32> to vector<8x256xf32>
    %c1_52 = arith.constant 1 : index
    %c0_53 = arith.constant 0 : index
    %103 = vector.load %arg7[%c1_52, %c0_53] : memref<2x256xf32, #tpu.memory_space<vmem>>, vector<1x256xf32>
    %104 = vector.shape_cast %103 : vector<1x256xf32> to vector<1x256xf32>
    %105 = vector.broadcast %104 : vector<1x256xf32> to vector<8x256xf32>
    %106 = vector.extract_strided_slice %17 {offsets = [0, 0], sizes = [8, 1], strides = [1, 1]} : vector<8x4xf32> to vector<8x1xf32>
    %107 = vector.extract_strided_slice %17 {offsets = [0, 1], sizes = [8, 1], strides = [1, 1]} : vector<8x4xf32> to vector<8x1xf32>
    %108 = vector.extract_strided_slice %17 {offsets = [0, 2], sizes = [8, 1], strides = [1, 1]} : vector<8x4xf32> to vector<8x1xf32>
    %109 = vector.extract_strided_slice %17 {offsets = [0, 3], sizes = [8, 1], strides = [1, 1]} : vector<8x4xf32> to vector<8x1xf32>
    %110 = vector.broadcast %106 : vector<8x1xf32> to vector<8x256xf32>
    %111 = arith.subf %102, %110 : vector<8x256xf32>
    %cst_54 = arith.constant 9.99999997E-7 : f32
    %112 = vector.broadcast %cst_54 : f32 to vector<8x256xf32>
    %113 = arith.addf %111, %112 : vector<8x256xf32>
    %114 = vector.broadcast %107 : vector<8x1xf32> to vector<8x256xf32>
    %115 = arith.subf %105, %114 : vector<8x256xf32>
    %cst_55 = arith.constant 9.99999997E-7 : f32
    %116 = vector.broadcast %cst_55 : f32 to vector<8x256xf32>
    %117 = arith.addf %115, %116 : vector<8x256xf32>
    %118 = arith.mulf %113, %113 : vector<8x256xf32>
    %119 = arith.mulf %117, %117 : vector<8x256xf32>
    %120 = arith.addf %118, %119 : vector<8x256xf32>
    %121 = math.sqrt %120 : vector<8x256xf32>
    %122 = vector.broadcast %108 : vector<8x1xf32> to vector<8x256xf32>
    %123 = arith.subf %102, %122 : vector<8x256xf32>
    %cst_56 = arith.constant 9.99999997E-7 : f32
    %124 = vector.broadcast %cst_56 : f32 to vector<8x256xf32>
    %125 = arith.addf %123, %124 : vector<8x256xf32>
    %126 = vector.broadcast %109 : vector<8x1xf32> to vector<8x256xf32>
    %127 = arith.subf %105, %126 : vector<8x256xf32>
    %cst_57 = arith.constant 9.99999997E-7 : f32
    %128 = vector.broadcast %cst_57 : f32 to vector<8x256xf32>
    %129 = arith.addf %127, %128 : vector<8x256xf32>
    %130 = arith.mulf %125, %125 : vector<8x256xf32>
    %131 = arith.mulf %129, %129 : vector<8x256xf32>
    %132 = arith.addf %130, %131 : vector<8x256xf32>
    %133 = math.sqrt %132 : vector<8x256xf32>
    %cst_58 = arith.constant 6.000000e+00 : f32
    %134 = vector.broadcast %cst_58 : f32 to vector<8x256xf32>
    %135 = arith.cmpf ogt, %133, %134 : vector<8x256xf32>
    %136 = arith.extui %135 : vector<8x256xi1> to vector<8x256xi32>
    %137 = arith.sitofp %136 : vector<8x256xi32> to vector<8x256xf32>
    %cst_59 = arith.constant 6.000000e+00 : f32
    %138 = vector.broadcast %cst_59 : f32 to vector<8x256xf32>
    %139 = arith.cmpf ogt, %121, %138 : vector<8x256xf32>
    %140 = arith.extui %139 : vector<8x256xi1> to vector<8x256xi32>
    %141 = arith.sitofp %140 : vector<8x256xi32> to vector<8x256xf32>
    %142 = arith.addf %49, %81 : vector<8x256xf32>
    %cst_60 = arith.constant 1.000000e+00 : f32
    %143 = vector.broadcast %cst_60 : f32 to vector<8x256xf32>
    %144 = arith.subf %143, %49 : vector<8x256xf32>
    %cst_61 = arith.constant 1.000000e+00 : f32
    %145 = vector.broadcast %cst_61 : f32 to vector<8x256xf32>
    %146 = arith.subf %145, %81 : vector<8x256xf32>
    %147 = arith.mulf %137, %142 : vector<8x256xf32>
    %cst_62 = arith.constant 0.333333343 : f32
    %148 = vector.broadcast %cst_62 : f32 to vector<8x256xf32>
    %149 = arith.mulf %121, %148 : vector<8x256xf32>
    %cst_63 = arith.constant 1.000000e+00 : f32
    %150 = vector.broadcast %cst_63 : f32 to vector<8x256xf32>
    %151 = arith.subf %150, %149 : vector<8x256xf32>
    %152 = math.exp %151 : vector<8x256xf32>
    %cst_64 = arith.constant 0.166666672 : f32
    %153 = vector.broadcast %cst_64 : f32 to vector<8x256xf32>
    %154 = arith.mulf %121, %153 : vector<8x256xf32>
    %cst_65 = arith.constant 1.000000e+00 : f32
    %155 = vector.broadcast %cst_65 : f32 to vector<8x256xf32>
    %156 = arith.subf %155, %154 : vector<8x256xf32>
    %157 = math.exp %156 : vector<8x256xf32>
    %cst_66 = arith.constant 1.000000e+00 : f32
    %158 = vector.broadcast %cst_66 : f32 to vector<8x256xf32>
    %159 = arith.subf %152, %158 : vector<8x256xf32>
    %cst_67 = arith.constant 1.000000e+00 : f32
    %160 = vector.broadcast %cst_67 : f32 to vector<8x256xf32>
    %161 = arith.subf %157, %160 : vector<8x256xf32>
    %162 = arith.mulf %147, %102 : vector<8x256xf32>
    %cst_68 = arith.constant dense<0.000000e+00> : vector<8xf32>
    %163 = vector.multi_reduction <add>, %162, %cst_68 [1] : vector<8x256xf32> to vector<8xf32>
    %164 = vector.shape_cast %163 : vector<8xf32> to vector<8x1xf32>
    %165 = arith.mulf %147, %105 : vector<8x256xf32>
    %cst_69 = arith.constant dense<0.000000e+00> : vector<8xf32>
    %166 = vector.multi_reduction <add>, %165, %cst_69 [1] : vector<8x256xf32> to vector<8xf32>
    %167 = vector.shape_cast %166 : vector<8xf32> to vector<8x1xf32>
    %cst_70 = arith.constant dense<0.000000e+00> : vector<8xf32>
    %168 = vector.multi_reduction <add>, %147, %cst_70 [1] : vector<8x256xf32> to vector<8xf32>
    %169 = vector.shape_cast %168 : vector<8xf32> to vector<8x1xf32>
    %cst_71 = arith.constant 0.000000e+00 : f32
    %170 = vector.broadcast %cst_71 : f32 to vector<8x256xf32>
    %171 = arith.subf %170, %159 : vector<8x256xf32>
    %cst_72 = arith.constant 0.000000e+00 : f32
    %172 = vector.broadcast %cst_72 : f32 to vector<8x256xf32>
    %173 = arith.maximumf %171, %172 : vector<8x256xf32>
    %174 = arith.mulf %173, %137 : vector<8x256xf32>
    %175 = arith.mulf %174, %49 : vector<8x256xf32>
    %cst_73 = arith.constant dense<0.000000e+00> : vector<8xf32>
    %176 = vector.multi_reduction <add>, %175, %cst_73 [1] : vector<8x256xf32> to vector<8xf32>
    %177 = vector.shape_cast %176 : vector<8xf32> to vector<8x1xf32>
    %cst_74 = arith.constant 2.000000e-01 : f32
    %178 = vector.broadcast %cst_74 : f32 to vector<8x1xf32>
    %179 = arith.mulf %177, %178 : vector<8x1xf32>
    %cst_75 = arith.constant 0.000000e+00 : f32
    %180 = vector.broadcast %cst_75 : f32 to vector<8x256xf32>
    %181 = arith.subf %180, %161 : vector<8x256xf32>
    %cst_76 = arith.constant 0.000000e+00 : f32
    %182 = vector.broadcast %cst_76 : f32 to vector<8x256xf32>
    %183 = arith.maximumf %181, %182 : vector<8x256xf32>
    %184 = arith.mulf %183, %137 : vector<8x256xf32>
    %185 = arith.mulf %184, %81 : vector<8x256xf32>
    %cst_77 = arith.constant dense<0.000000e+00> : vector<8xf32>
    %186 = vector.multi_reduction <add>, %185, %cst_77 [1] : vector<8x256xf32> to vector<8xf32>
    %187 = vector.shape_cast %186 : vector<8xf32> to vector<8x1xf32>
    %cst_78 = arith.constant 2.000000e-01 : f32
    %188 = vector.broadcast %cst_78 : f32 to vector<8x1xf32>
    %189 = arith.mulf %187, %188 : vector<8x1xf32>
    %cst_79 = arith.constant 0.000000e+00 : f32
    %190 = vector.broadcast %cst_79 : f32 to vector<8x256xf32>
    %191 = arith.maximumf %159, %190 : vector<8x256xf32>
    %192 = arith.mulf %191, %144 : vector<8x256xf32>
    %cst_80 = arith.constant dense<0.000000e+00> : vector<8xf32>
    %193 = vector.multi_reduction <add>, %192, %cst_80 [1] : vector<8x256xf32> to vector<8xf32>
    %194 = vector.shape_cast %193 : vector<8xf32> to vector<8x1xf32>
    %cst_81 = arith.constant 0.000000e+00 : f32
    %195 = vector.broadcast %cst_81 : f32 to vector<8x256xf32>
    %196 = arith.maximumf %161, %195 : vector<8x256xf32>
    %197 = arith.mulf %196, %146 : vector<8x256xf32>
    %cst_82 = arith.constant dense<0.000000e+00> : vector<8xf32>
    %198 = vector.multi_reduction <add>, %197, %cst_82 [1] : vector<8x256xf32> to vector<8xf32>
    %199 = vector.shape_cast %198 : vector<8xf32> to vector<8x1xf32>
    %200 = arith.mulf %141, %142 : vector<8x256xf32>
    %cst_83 = arith.constant 0.333333343 : f32
    %201 = vector.broadcast %cst_83 : f32 to vector<8x256xf32>
    %202 = arith.mulf %133, %201 : vector<8x256xf32>
    %cst_84 = arith.constant 1.000000e+00 : f32
    %203 = vector.broadcast %cst_84 : f32 to vector<8x256xf32>
    %204 = arith.subf %203, %202 : vector<8x256xf32>
    %205 = math.exp %204 : vector<8x256xf32>
    %cst_85 = arith.constant 0.166666672 : f32
    %206 = vector.broadcast %cst_85 : f32 to vector<8x256xf32>
    %207 = arith.mulf %133, %206 : vector<8x256xf32>
    %cst_86 = arith.constant 1.000000e+00 : f32
    %208 = vector.broadcast %cst_86 : f32 to vector<8x256xf32>
    %209 = arith.subf %208, %207 : vector<8x256xf32>
    %210 = math.exp %209 : vector<8x256xf32>
    %cst_87 = arith.constant 1.000000e+00 : f32
    %211 = vector.broadcast %cst_87 : f32 to vector<8x256xf32>
    %212 = arith.subf %205, %211 : vector<8x256xf32>
    %cst_88 = arith.constant 1.000000e+00 : f32
    %213 = vector.broadcast %cst_88 : f32 to vector<8x256xf32>
    %214 = arith.subf %210, %213 : vector<8x256xf32>
    %215 = arith.mulf %200, %102 : vector<8x256xf32>
    %cst_89 = arith.constant dense<0.000000e+00> : vector<8xf32>
    %216 = vector.multi_reduction <add>, %215, %cst_89 [1] : vector<8x256xf32> to vector<8xf32>
    %217 = vector.shape_cast %216 : vector<8xf32> to vector<8x1xf32>
    %218 = arith.mulf %200, %105 : vector<8x256xf32>
    %cst_90 = arith.constant dense<0.000000e+00> : vector<8xf32>
    %219 = vector.multi_reduction <add>, %218, %cst_90 [1] : vector<8x256xf32> to vector<8xf32>
    %220 = vector.shape_cast %219 : vector<8xf32> to vector<8x1xf32>
    %cst_91 = arith.constant dense<0.000000e+00> : vector<8xf32>
    %221 = vector.multi_reduction <add>, %200, %cst_91 [1] : vector<8x256xf32> to vector<8xf32>
    %222 = vector.shape_cast %221 : vector<8xf32> to vector<8x1xf32>
    %cst_92 = arith.constant 0.000000e+00 : f32
    %223 = vector.broadcast %cst_92 : f32 to vector<8x256xf32>
    %224 = arith.subf %223, %212 : vector<8x256xf32>
    %cst_93 = arith.constant 0.000000e+00 : f32
    %225 = vector.broadcast %cst_93 : f32 to vector<8x256xf32>
    %226 = arith.maximumf %224, %225 : vector<8x256xf32>
    %227 = arith.mulf %226, %141 : vector<8x256xf32>
    %228 = arith.mulf %227, %49 : vector<8x256xf32>
    %cst_94 = arith.constant dense<0.000000e+00> : vector<8xf32>
    %229 = vector.multi_reduction <add>, %228, %cst_94 [1] : vector<8x256xf32> to vector<8xf32>
    %230 = vector.shape_cast %229 : vector<8xf32> to vector<8x1xf32>
    %cst_95 = arith.constant 2.000000e-01 : f32
    %231 = vector.broadcast %cst_95 : f32 to vector<8x1xf32>
    %232 = arith.mulf %230, %231 : vector<8x1xf32>
    %cst_96 = arith.constant 0.000000e+00 : f32
    %233 = vector.broadcast %cst_96 : f32 to vector<8x256xf32>
    %234 = arith.subf %233, %214 : vector<8x256xf32>
    %cst_97 = arith.constant 0.000000e+00 : f32
    %235 = vector.broadcast %cst_97 : f32 to vector<8x256xf32>
    %236 = arith.maximumf %234, %235 : vector<8x256xf32>
    %237 = arith.mulf %236, %141 : vector<8x256xf32>
    %238 = arith.mulf %237, %81 : vector<8x256xf32>
    %cst_98 = arith.constant dense<0.000000e+00> : vector<8xf32>
    %239 = vector.multi_reduction <add>, %238, %cst_98 [1] : vector<8x256xf32> to vector<8xf32>
    %240 = vector.shape_cast %239 : vector<8xf32> to vector<8x1xf32>
    %cst_99 = arith.constant 2.000000e-01 : f32
    %241 = vector.broadcast %cst_99 : f32 to vector<8x1xf32>
    %242 = arith.mulf %240, %241 : vector<8x1xf32>
    %cst_100 = arith.constant 0.000000e+00 : f32
    %243 = vector.broadcast %cst_100 : f32 to vector<8x256xf32>
    %244 = arith.maximumf %212, %243 : vector<8x256xf32>
    %245 = arith.mulf %244, %144 : vector<8x256xf32>
    %cst_101 = arith.constant dense<0.000000e+00> : vector<8xf32>
    %246 = vector.multi_reduction <add>, %245, %cst_101 [1] : vector<8x256xf32> to vector<8xf32>
    %247 = vector.shape_cast %246 : vector<8xf32> to vector<8x1xf32>
    %cst_102 = arith.constant 0.000000e+00 : f32
    %248 = vector.broadcast %cst_102 : f32 to vector<8x256xf32>
    %249 = arith.maximumf %214, %248 : vector<8x256xf32>
    %250 = arith.mulf %249, %146 : vector<8x256xf32>
    %cst_103 = arith.constant dense<0.000000e+00> : vector<8xf32>
    %251 = vector.multi_reduction <add>, %250, %cst_103 [1] : vector<8x256xf32> to vector<8xf32>
    %252 = vector.shape_cast %251 : vector<8xf32> to vector<8x1xf32>
    %cst_104 = arith.constant dense<0.000000e+00> : vector<8xf32>
    %253 = vector.multi_reduction <add>, %49, %cst_104 [1] : vector<8x256xf32> to vector<8xf32>
    %254 = vector.shape_cast %253 : vector<8xf32> to vector<8x1xf32>
    %cst_105 = arith.constant dense<0.000000e+00> : vector<8xf32>
    %255 = vector.multi_reduction <add>, %81, %cst_105 [1] : vector<8x256xf32> to vector<8xf32>
    %256 = vector.shape_cast %255 : vector<8xf32> to vector<8x1xf32>
    %c0_i32 = arith.constant 0 : i32
    %257 = arith.cmpi eq, %arg2, %c0_i32 : i32
    %258 = arith.extui %257 : i1 to i32
    %c0_i32_106 = arith.constant 0 : i32
    %259 = arith.cmpi ne, %258, %c0_i32_106 : i32
    scf.if %259 {
      %cst_131 = arith.constant 5.000000e-01 : f32
      %324 = vector.broadcast %cst_131 : f32 to vector<1x256xf32>
      %c0_132 = arith.constant 0 : index
      %c0_133 = arith.constant 0 : index
      %325 = vector.load %arg9[%c0_132, %c0_133] : memref<1x256xf32, #tpu.memory_space<vmem>>, vector<1x256xf32>
      tpu.vector_store %arg9[%c0_132, %c0_133], %324 {strides = array<i32>} : memref<1x256xf32, #tpu.memory_space<vmem>>, vector<1x256xf32>,
    } else {
    }
    %260 = arith.subf %1, %3 : vector<8x256xf32>
    %cst_107 = arith.constant 1.42857146 : f32
    %261 = vector.broadcast %cst_107 : f32 to vector<8x256xf32>
    %262 = arith.mulf %260, %261 : vector<8x256xf32>
    %263 = math.absf %262 : vector<8x256xf32>
    %cst_108 = arith.constant 0.000000e+00 : f32
    %264 = vector.broadcast %cst_108 : f32 to vector<8x256xf32>
    %265 = arith.subf %264, %263 : vector<8x256xf32>
    %266 = math.exp %265 : vector<8x256xf32>
    %267 = math.log1p %266 : vector<8x256xf32>
    %cst_109 = arith.constant 0.000000e+00 : f32
    %268 = vector.broadcast %cst_109 : f32 to vector<8x256xf32>
    %269 = arith.subf %268, %262 : vector<8x256xf32>
    %cst_110 = arith.constant 0.000000e+00 : f32
    %270 = vector.broadcast %cst_110 : f32 to vector<8x256xf32>
    %271 = arith.maximumf %269, %270 : vector<8x256xf32>
    %272 = arith.addf %271, %267 : vector<8x256xf32>
    %cst_111 = arith.constant 0.000000e+00 : f32
    %273 = vector.broadcast %cst_111 : f32 to vector<8x256xf32>
    %274 = arith.subf %273, %272 : vector<8x256xf32>
    %cst_112 = arith.constant -1.000000e+02 : f32
    %275 = vector.broadcast %cst_112 : f32 to vector<8x256xf32>
    %276 = arith.maximumf %274, %275 : vector<8x256xf32>
    %cst_113 = arith.constant 0.000000e+00 : f32
    %277 = vector.broadcast %cst_113 : f32 to vector<8x256xf32>
    %278 = arith.maximumf %262, %277 : vector<8x256xf32>
    %279 = arith.addf %278, %267 : vector<8x256xf32>
    %cst_114 = arith.constant 0.000000e+00 : f32
    %280 = vector.broadcast %cst_114 : f32 to vector<8x256xf32>
    %281 = arith.subf %280, %279 : vector<8x256xf32>
    %cst_115 = arith.constant -1.000000e+02 : f32
    %282 = vector.broadcast %cst_115 : f32 to vector<8x256xf32>
    %283 = arith.maximumf %281, %282 : vector<8x256xf32>
    %cst_116 = arith.constant 0.000000e+00 : f32
    %284 = vector.broadcast %cst_116 : f32 to vector<8x256xf32>
    %285 = arith.cmpf oge, %262, %284 : vector<8x256xf32>
    %cst_117 = arith.constant 1.000000e+00 : f32
    %286 = vector.broadcast %cst_117 : f32 to vector<8x256xf32>
    %287 = arith.select %285, %286, %266 : vector<8x256xi1>, vector<8x256xf32>
    %cst_118 = arith.constant 1.000000e+00 : f32
    %288 = vector.broadcast %cst_118 : f32 to vector<8x256xf32>
    %289 = arith.addf %288, %266 : vector<8x256xf32>
    %290 = arith.divf %287, %289 : vector<8x256xf32>
    %c0_119 = arith.constant 0 : index
    %c0_120 = arith.constant 0 : index
    %291 = vector.load %arg9[%c0_119, %c0_120] : memref<1x256xf32, #tpu.memory_space<vmem>>, vector<1x256xf32>
    %292 = vector.extract_strided_slice %290 {offsets = [0, 0], sizes = [7, 256], strides = [1, 1]} : vector<8x256xf32> to vector<7x256xf32>
    %293 = tpu.concatenate %291, %292 in 0 : vector<1x256xf32>, vector<7x256xf32> -> vector<8x256xf32>
    %294 = vector.extract_strided_slice %290 {offsets = [7, 0], sizes = [1, 256], strides = [1, 1]} : vector<8x256xf32> to vector<1x256xf32>
    %c0_121 = arith.constant 0 : index
    %c0_122 = arith.constant 0 : index
    %295 = vector.load %arg9[%c0_121, %c0_122] : memref<1x256xf32, #tpu.memory_space<vmem>>, vector<1x256xf32>
    tpu.vector_store %arg9[%c0_121, %c0_122], %294 {strides = array<i32>} : memref<1x256xf32, #tpu.memory_space<vmem>>, vector<1x256xf32>,
    %296 = tpu.iota {dimensions = array<i32: 0>} : vector<8x1xi32>
    %c8_i32 = arith.constant 8 : i32
    %297 = arith.muli %arg2, %c8_i32 : i32
    %298 = vector.broadcast %297 : i32 to vector<8x1xi32>
    %299 = arith.addi %296, %298 : vector<8x1xi32>
    %c1_i32 = arith.constant 1 : i32
    %300 = vector.broadcast %c1_i32 : i32 to vector<8x1xi32>
    %301 = arith.cmpi sge, %299, %300 : vector<8x1xi32>
    %c6_i32 = arith.constant 6 : i32
    %302 = vector.broadcast %c6_i32 : i32 to vector<8x1xi32>
    %303 = arith.cmpi sle, %299, %302 : vector<8x1xi32>
    %304 = arith.andi %301, %303 : vector<8x1xi1>
    %305 = arith.extui %304 : vector<8x1xi1> to vector<8x1xi32>
    %306 = arith.sitofp %305 : vector<8x1xi32> to vector<8x1xf32>
    %cst_123 = arith.constant -2.000000e+00 : f32
    %307 = vector.broadcast %cst_123 : f32 to vector<8x1xf32>
    %308 = arith.mulf %306, %307 : vector<8x1xf32>
    %309 = arith.mulf %293, %276 : vector<8x256xf32>
    %cst_124 = arith.constant 1.000000e+00 : f32
    %310 = vector.broadcast %cst_124 : f32 to vector<8x256xf32>
    %311 = arith.subf %310, %293 : vector<8x256xf32>
    %312 = arith.mulf %311, %283 : vector<8x256xf32>
    %313 = arith.addf %309, %312 : vector<8x256xf32>
    %cst_125 = arith.constant dense<0.000000e+00> : vector<8xf32>
    %314 = vector.multi_reduction <add>, %313, %cst_125 [1] : vector<8x256xf32> to vector<8xf32>
    %315 = vector.shape_cast %314 : vector<8xf32> to vector<8x1xf32>
    %316 = arith.mulf %308, %315 : vector<8x1xf32>
    %cst_126 = arith.constant 0.000000e+00 : f32
    %317 = vector.broadcast %cst_126 : f32 to vector<8x107xf32>
    %318 = tpu.concatenate %84, %93, %96, %99, %164, %167, %169, %179, %189, %194, %199, %217, %220, %222, %232, %242 in 1 : vector<8x1xf32>, vector<8x1xf32>, vector<8x1xf32>, vector<8x1xf32>, vector<8x1xf32>, vector<8x1xf32>, vector<8x1xf32>, vector<8x1xf32>, vector<8x1xf32>, vector<8x1xf32>, vector<8x1xf32>, vector<8x1xf32>, vector<8x1xf32>, vector<8x1xf32>, vector<8x1xf32>, vector<8x1xf32> -> vector<8x16xf32>
    %319 = tpu.concatenate %247, %252, %254, %256, %316, %317 in 1 : vector<8x1xf32>, vector<8x1xf32>, vector<8x1xf32>, vector<8x1xf32>, vector<8x1xf32>, vector<8x107xf32> -> vector<8x112xf32>
    %320 = tpu.concatenate %318, %319 in 1 : vector<8x16xf32>, vector<8x112xf32> -> vector<8x128xf32>
    %c0_127 = arith.constant 0 : index
    %c0_128 = arith.constant 0 : index
    %c0_129 = arith.constant 0 : index
    %c0_130 = arith.constant 0 : index
    %321 = vector.load %arg8[%c0_127, %c0_128, %c0_129, %c0_130] : memref<1x1x8x128xf32, #tpu.memory_space<vmem>>, vector<1x1x8x128xf32>
    %322 = vector.shape_cast %321 : vector<1x1x8x128xf32> to vector<8x128xf32>
    %323 = vector.shape_cast %320 : vector<8x128xf32> to vector<1x1x8x128xf32>
    tpu.vector_store %arg8[%c0_127, %c0_128, %c0_129, %c0_130], %323 {strides = array<i32>} : memref<1x1x8x128xf32, #tpu.memory_space<vmem>>, vector<1x1x8x128xf32>,
    return
  }
  func.func @transform_0(%arg0: i32, %arg1: i32, %arg2: i32) -> (i32, i32, i32, i32) {
    %c0_i32 = arith.constant 0 : i32
    %c0_i32_0 = arith.constant 0 : i32
    return %arg0, %c0_i32, %arg2, %arg1 : i32, i32, i32, i32
  }
  func.func @transform_1(%arg0: i32, %arg1: i32, %arg2: i32) -> (i32, i32, i32, i32) {
    %c0_i32 = arith.constant 0 : i32
    %c0_i32_0 = arith.constant 0 : i32
    return %arg0, %c0_i32, %arg2, %arg1 : i32, i32, i32, i32
  }
  func.func @transform_2(%arg0: i32, %arg1: i32, %arg2: i32) -> (i32, i32, i32, i32) {
    %c0_i32 = arith.constant 0 : i32
    %c0_i32_0 = arith.constant 0 : i32
    return %arg0, %c0_i32, %arg2, %arg1 : i32, i32, i32, i32
  }
  func.func @transform_3(%arg0: i32, %arg1: i32, %arg2: i32) -> (i32, i32, i32) {
    %c0_i32 = arith.constant 0 : i32
    %c0_i32_0 = arith.constant 0 : i32
    return %arg0, %arg2, %c0_i32 : i32, i32, i32
  }
  func.func @transform_4(%arg0: i32, %arg1: i32, %arg2: i32) -> (i32, i32) {
    %c0_i32 = arith.constant 0 : i32
    %c0_i32_0 = arith.constant 0 : i32
    return %c0_i32, %arg1 : i32, i32
  }
  func.func @transform_5(%arg0: i32, %arg1: i32, %arg2: i32) -> (i32, i32, i32, i32) {
    %c0_i32 = arith.constant 0 : i32
    %c0_i32_0 = arith.constant 0 : i32
    return %arg0, %arg1, %arg2, %c0_i32 : i32, i32, i32, i32
  }
}

</mosaic_0001>

<bundles_post_ra>
// kernel: _lambda_.1
= control target key start
LH: loop header
LB: loop body
LE: loop exit
PB: predicated region body
PF: predicated region fallthrough
CT: control target
= control target key end

     0   :  { %s1424_s18 = smov 0   ;;  %s1426_s19 = smov 0   ;;  %s1808_s0 = inlined_call_operand.vmem [shape: f32[2,2,8,256], index: 0, kind: input, shape index: {}]   ;;  %s1809_s1 = inlined_call_operand.vmem [shape: bf16[2,2,8,256], index: 1, kind: input, shape index: {}]   ;;  %s1810_s2 = inlined_call_operand.vmem [shape: bf16[2,2,8,256], index: 2, kind: input, shape index: {}]   ;;  %s1811_s3 = inlined_call_operand.vmem [shape: f32[2,8,4], index: 3, kind: input, shape index: {}]   ;;  %s1812_s4 = inlined_call_operand.vmem [shape: f32[2,256], index: 4, kind: input, shape index: {}]   ;;  %s1813_s5 = inlined_call_operand.vmem [shape: f32[2,1,8,128], index: 5, kind: output, shape index: {}]  }
   0x1   :  { %s1428_s20 = smov 0  }
   0x2 LB: > { %s34_s21 = sadd.s32 1, %s1380_s19  ;;  %p1234_p0 = scmp.ge.s32.totalorder %s1384_s20, 1  ;;  %s1384_s20 = sphi %s1428_s20, %s15_s20   ;;  %s1380_s19 = sphi %s1426_s19, %s1817_s19   ;;  %s1376_s18 = sphi %s1424_s18, %s1816_s18  }
   0x3   : > { %p36_p1 = scmp.ge.s32.totalorder %s34_s21, 2  ;;  %p294_p2 = scmp.lt.s32.totalorder %s1384_s20, 3 }
   0x5   : > { %s1819_s21 = smov (%p36_p1, %s34_s21), 0  ;;  %p295_p3 = pnand %p1234_p0, %p294_p2 }
   0x6   : > { %p374_p4 = scmp.lt.s32.totalorder (!%p295_p3), %s1376_s18, 1  ;;  %v1386_v0 = vmov (!%p295_p3), 2   ;;  %v1387_v1 = vmov (!%p295_p3), 0   ;;  %v1388_v11 = vmov (!%p295_p3), 1   ;;  %v1389_v12 = vmov (!%p295_p3), 3   ;;  %s1393_s16 = smov (!%p295_p3), 16  }
   0x7   : > { %298 = sbr.rel (%p295_p3) target bundleno = 471 (0x1d7), region = 40  ;;  %1298 = vset.pattern.permute.xlu0 (!%p295_p3), %v1386_v0  ;;  %1300 = vset.pattern.permute.xlu1 (!%p295_p3), %v1387_v1  ;;  %v612_v44 = vlaneseq (!%p295_p3)  ;;  %v1390_v49 = vmov (!%p295_p3), 0.5   ;;  %vm963_vm7 = vcmask (!%p295_p3), 1040384  }
   0x9   : > { %v1495_v47 = vshrl.u32 (!%p295_p3), %v612_v44, 7  ;;  %vm1497_vm2 = vcmp.lt.s32.totalorder (!%p295_p3), %v612_v44, 256 }
   0xa   : > { %886 = vst.msk [vmem:[#allocation2] sm:$0x3] (!%p295_p3), %vm1497_vm2, %v1390_v49 }
   0xb   : > { %v1504_v52 = vsub.s32 (!%p295_p3), 0, %v1495_v47 }
   0xe   : > { %s1821_s18 = smov (!%p374_p4, %s1376_s18), 1 }
   0xf   : > { %s1241_s22 = sshll.u32 %s1821_s18, 3  ;;  %s1263_s23 = sshll.u32 %s1821_s18, 5 }
  0x10   : > { %s421_s26 = scalar_lea.vmem %s1811_s3, %s1241_s22  ;;  %s385_s29 = scalar_lea.vmem %s1808_s0, %s1263_s23 }
  0x11   : > { %v457_v2 = vld [vmem:[%s421_s26] sm:$0xff]  ;;  %v1456_v4 = vld [vmem:[%s385_s29 + $0x8] sm:$0xff]  ;;  %v1460_v13 = vld [vmem:[%s385_s29 + $0x10] sm:$0xff]  ;;  %s1264_s30 = sshll.u32 %s1821_s18, 4  ;;  %s437_s24 = scalar_lea.vmem %s1813_s5, %s1241_s22 }
  0x12   : > { %v1454_v3 = vld [vmem:[%s385_s29] sm:$0xff]  ;;  %637 = vperm.xlu1 %1300, %v457_v2   ;;  %v459_v6 = vand.u32 2147483647, %v1456_v4  ;;  %673 = vperm.xlu0 %1298, %v457_v2   ;;  %v1462_v14 = vld [vmem:[%s385_s29 + $0x18] sm:$0xff]  ;;  %vm511_vm1 = vcmp.ge.f32.partialorder %v1456_v4, 0.0  ;;  %s399_s8 = scalar_lea.vmem %s1809_s1, %s1264_s30  ;;  %s413_s11 = scalar_lea.vmem %s1810_s2, %s1264_s30  ;;  %v546_v48 = vsub.f32 0.0, %v1460_v13 }
  0x13   : > { %v458_v5 = vand.u32 2147483647, %v1454_v3  ;;  %v887_v15 = vsub.f32 %v1454_v3, %v1460_v13  ;;  %v888_v16 = vsub.f32 %v1456_v4, %v1462_v14  ;;  %vm510_vm0 = vcmp.ge.f32.partialorder %v1454_v3, 0.0 }
  0x14   : > { %v461_v8 = vsub.f32 0.0, %v459_v6  ;;  %v520_v35 = vand.u32 2147483647, %v1460_v13  ;;  %v521_v37 = vand.u32 2147483647, %v1462_v14  ;;  %vm572_vm12 = vcmp.ge.f32.partialorder %v1460_v13, 0.0 }
  0x15   : > { %v460_v7 = vsub.f32 0.0, %v458_v5  ;;  %v1468_v17 = vmul.f32 1.4285715, %v887_v15  ;;  %v1470_v18 = vmul.f32 1.4285715, %v888_v16  ;;  %vm573_vm13 = vcmp.ge.f32.partialorder %v1462_v14, 0.0 }
  0x16   : > { %v464_v10 = vmul.f32 1.442695, %v461_v8  ;;  %1301 = vset.pattern.permute.xlu1 %v1388_v11  ;;  %1299 = vset.pattern.permute.xlu0 %v1389_v12  ;;  %v522_v42 = vsub.f32 0.0, %v520_v35  ;;  %v523_v43 = vsub.f32 0.0, %v521_v37  ;;  %v1511_v8 = vsub.s32 1, %v1495_v47 }
  0x17   : > { %v462_v9 = vmul.f32 1.442695, %v460_v7  ;;  %645 = vperm.xlu1 %1301, %v457_v2   ;;  %681 = vperm.xlu0 %1299, %v457_v2   ;;  %v891_v22 = vand.u32 2147483647, %v1468_v17  ;;  %v892_v23 = vand.u32 2147483647, %v1470_v18 }
  0x18   : > { %v524_v45 = vmul.f32 1.442695, %v522_v42  ;;  %v526_v46 = vmul.f32 1.442695, %v523_v43  ;;  %v917_v58 = vsub.f32 0.0, %v1468_v17  ;;  %v918_v59 = vsub.f32 0.0, %v1470_v18 }
  0x19   : > { %1302 = vpow2.f32 %v462_v9  ;;  %v893_v25 = vsub.f32 0.0, %v891_v22  ;;  %v894_v26 = vsub.f32 0.0, %v892_v23  ;;  %vm935_vm3 = vcmp.ge.f32.partialorder %v1468_v17, 0.0  ;;  %v945_v11 = vld [vmem:[#allocation2] sm:$0x3] }
  0x1a   : > { %1304 = vpow2.f32 %v464_v10  ;;  %v919_v2 = vmax.f32 %v917_v58, 0.0  ;;  %v920_v5 = vmax.f32 %v918_v59, 0.0  ;;  %v927_v6 = vmax.f32 %v1468_v17, 0.0 }
  0x1b   : > { %v895_v27 = vmul.f32 1.442695, %v893_v25  ;;  %v897_v28 = vmul.f32 1.442695, %v894_v26  ;;  %v928_v10 = vmax.f32 %v1470_v18, 0.0  ;;  %vm936_vm6 = vcmp.ge.f32.partialorder %v1470_v18, 0.0 }
  0x1c   : > { %v950_v26 = vrot.slane %v945_v11, %v1504_v52  ;;  %v954_v35 = vrot.slane %v945_v11, %v1511_v8 }
  0x23   : > { %v1472_v19 = vpop.eup %1302 }
  0x24   : > { %v1474_v20 = vpop.eup %1304  ;;  %v466_v21 = vadd.f32 1.0, %v1472_v19  ;;  %v512_v29 = vsel %vm510_vm0, 1.0, %v1472_v19 }
  0x25   : > { %v1480_v24 = vadd.f32 1.0, %v1474_v20  ;;  %v513_v30 = vsel %vm511_vm1, 1.0, %v1474_v20 }
  0x26   : > { %1306 = vrcp.f32 %v466_v21 }
  0x27   : > { %1308 = vrcp.f32 %v1480_v24 }
  0x28   : > { %1310 = vpow2.f32 %v895_v27 }
  0x29   : > { %1312 = vpow2.f32 %v897_v28 }
  0x30   : > { %v1307_v31 = vpop.eup %1306 }
  0x31   : > { %v1309_v32 = vpop.eup %1308  ;;  %v1487_v33 = vmul.f32 %v1307_v31, %v512_v29 }
  0x32   : > { %v1489_v34 = vmul.f32 %v1309_v32, %v513_v30  ;;  %v1311_v36 = vpop.eup %1310 }
  0x33   : > { %v1313_v39 = vpop.eup %1312  ;;  %v899_v40 = vadd.f32 1.0, %v1311_v36  ;;  %v902_v50 = vmul.f32 -0.5, %v1311_v36  ;;  %v905_v56 = vand.u32 2147483647, %v1311_v36  ;;  %v937_v23 = vsel %vm935_vm3, 1.0, %v1311_v36 }
  0x34   : > { %v872_v38 = vadd.f32 %v1489_v34, %v1487_v33  ;;  %v908_v41 = vadd.f32 1.0, %v1313_v39  ;;  %v911_v51 = vmul.f32 -0.5, %v1313_v39  ;;  %v914_v57 = vand.u32 2147483647, %v1313_v39 }
  0x35   : > { %1314 = vlog2.f32 %v899_v40  ;;  %v903_v53 = vadd.f32 1.0, %v902_v50  ;;  %vm906_vm4 = vcmp.lt.f32.partialorder %v905_v56, 0.0004427343  ;;  %v938_v25 = vsel %vm936_vm6, 1.0, %v1313_v39 }
  0x36   : > { %873 = vadd.xlane.f32.xlu0 %v872_v38  ;;  %1316 = vlog2.f32 %v908_v41  ;;  %v912_v54 = vadd.f32 1.0, %v911_v51  ;;  %vm915_vm5 = vcmp.lt.f32.partialorder %v914_v57, 0.0004427343  ;;  %v469_v56 = vmul.f32 -0.5, %v1472_v19 }
  0x37   : > { %1318 = vrcp.f32 %v899_v40  ;;  %v904_v62 = vmul.f32 %v1311_v36, %v903_v53  ;;  %v443_v53 = vld [vmem:[%s399_s8] sm:$0xff]  ;;  %v1391_v57 = vmov 1966171168  }
  0x38   : > { %1320 = vrcp.f32 %v908_v41  ;;  %v913_v63 = vmul.f32 %v1313_v39, %v912_v54  ;;  %v968_v58 = vunpack.c.l.s4 %v1391_v57 }
  0x39   : > { %1322 = vpow2.f32 %v524_v45 }
  0x3a   : > { %1324 = vpow2.f32 %v526_v46 }
  0x3b   : > { %1326 = vlog2.f32 %v466_v21 }
  0x3c   : > { %1328 = vlog2.f32 %v1480_v24 }
  0x3f   : > { %v1315_v55 = vpop.eup %1314 }
  0x40   : > { %v1317_v60 = vpop.eup %1316  ;;  %v901_v61 = vmul.f32 0.6931472, %v1315_v55 }
  0x41   : > { %v910_v0 = vmul.f32 0.6931472, %v1317_v60  ;;  %v1319_v7 = vpop.eup %1318  ;;  %v1539_v60 = vld [vmem:[%s399_s8 + $0x8] sm:$0xff] }
  0x42   : > { %v907_v1 = vsel %vm906_vm4, %v904_v62, %v901_v61  ;;  %v1321_v12 = vpop.eup %1320  ;;  %v942_v30 = vmul.f32 %v1319_v7, %v937_v23  ;;  %v1541_v61 = vld [vmem:[%s413_s11] sm:$0xff]  ;;  %v1545_v7 = vld [vmem:[%s413_s11 + $0x8] sm:$0xff] }
  0x43   : > { %v916_v9 = vsel %vm915_vm5, %v913_v63, %v910_v0  ;;  %v921_v15 = vadd.f32 %v919_v2, %v907_v1  ;;  %v929_v21 = vadd.f32 %v927_v6, %v907_v1  ;;  %v1520_v31 = vpop.eup %1322  ;;  %v944_v32 = vmul.f32 %v1321_v12, %v938_v25 }
  0x44   : > { %v922_v16 = vadd.f32 %v920_v5, %v916_v9  ;;  %v930_v22 = vadd.f32 %v928_v10, %v916_v9  ;;  %v1523_v18 = vpop.eup %1324  ;;  %v959_v36 = vrot.slane %v942_v30, 7  ;;  %v1529_v43 = vadd.f32 1.0, %v1520_v31 }
  0x45   : > { %v923_v27 = vsub.f32 0.0, %v921_v15  ;;  %v931_v29 = vsub.f32 0.0, %v929_v21  ;;  %v960_v39 = vrot.slane %v944_v32, 7  ;;  %v1327_v42 = vpop.eup %1326  ;;  %v1535_v49 = vadd.f32 1.0, %v1523_v18 }
  0x46   : > { %v924_v28 = vsub.f32 0.0, %v922_v16  ;;  %v932_v24 = vsub.f32 0.0, %v930_v22  ;;  %v964_v41 = vsel %vm963_vm7, %v950_v26, %v959_v36  ;;  %v1329_v54 = vpop.eup %1328  ;;  %1330 = vlog2.f32 %v1529_v43 }
  0x47   : > { %v925_v37 = vmax.f32 %v923_v27, -100.0  ;;  %v933_v38 = vmax.f32 %v931_v29, -100.0  ;;  %v965_v44 = vsel %vm963_vm7, %v954_v35, %v960_v39  ;;  %v1002_v46 = vsub.f32 1.0, %v964_v41 }
  0x48   : > { %v926_v17 = vmax.f32 %v924_v28, -100.0  ;;  %v934_v40 = vmax.f32 %v932_v24, -100.0  ;;  %v1003_v51 = vsub.f32 1.0, %v965_v44  ;;  %v444_v63 = vunpack.c.l.bf16 %v443_v53 }
  0x49   : > { %v1000_v45 = vmul.f32 %v964_v41, %v925_v37  ;;  %v1004_v55 = vmul.f32 %v1002_v46, %v933_v38  ;;  %v478_v0 = vmul.f32 -0.5, %v1474_v20  ;;  %1332 = vlog2.f32 %v1535_v49 }
  0x4a   : > { %v1001_v50 = vmul.f32 %v965_v44, %v926_v17  ;;  %v1005_v59 = vmul.f32 %v1003_v51, %v934_v40  ;;  %v966_v1 = vcombine.high %v942_v30, %v944_v32  ;;  %v969_v2 = vunpack.c.0.s8 %v968_v58 }
  0x4b   : > { %v1006_v62 = vadd.f32 %v1004_v55, %v1000_v45  ;;  %v445_v6 = vunpack.c.h.bf16 %v443_v53  ;;  %v448_v9 = vunpack.c.l.bf16 %v1539_v60  ;;  %v449_v10 = vunpack.c.h.bf16 %v1539_v60 }
  0x4c   : > { %v1007_v5 = vadd.f32 %v1005_v59, %v1001_v50  ;;  %v451_v11 = vunpack.c.l.bf16 %v1541_v61  ;;  %v470_v12 = vadd.f32 1.0, %v469_v56  ;;  %v972_v15 = vsub.s32 %v969_v2, %v1495_v47 }
  0x4d   : > { %v452_v21 = vunpack.c.h.bf16 %v1541_v61  ;;  %v468_v22 = vmul.f32 0.6931472, %v1327_v42  ;;  %v455_v23 = vunpack.c.l.bf16 %v1545_v7  ;;  %v456_v25 = vunpack.c.h.bf16 %v1545_v7 }
  0x4e   : > { %v1551_v16 = vadd.f32 %v1007_v5, %v1006_v62  ;;  %v471_v26 = vmul.f32 %v1472_v19, %v470_v12  ;;  %v472_v27 = vand.u32 2147483647, %v1472_v19  ;;  %v973_v28 = vrot.slane %v966_v1, %v972_v15 }
  0x4f   : > { %v477_v29 = vmul.f32 0.6931472, %v1329_v54  ;;  %v479_v30 = vadd.f32 1.0, %v478_v0  ;;  %v481_v24 = vand.u32 2147483647, %v1474_v20  ;;  %v1561_v32 = vmul.f32 %v451_v11, %v444_v63 }
  0x50   : > { %vm473_vm8 = vcmp.lt.f32.partialorder %v472_v27, 0.0004427343  ;;  %v484_v35 = vsub.f32 0.0, %v1454_v3  ;;  %v485_v37 = vsub.f32 0.0, %v1456_v4  ;;  %v974_v17 = vcombine.high %v973_v28, %v973_v28  ;;  %v1331_v19 = vpop.eup %1330 }
  0x51   : > { %v474_v36 = vsel %vm473_vm8, %v471_v26, %v468_v22  ;;  %v480_v38 = vmul.f32 %v1474_v20, %v479_v30  ;;  %vm482_vm9 = vcmp.lt.f32.partialorder %v481_v24, 0.0004427343  ;;  %v1568_v39 = vmul.f32 %v452_v21, %v445_v6 }
  0x52   : > { %v486_v40 = vmax.f32 %v484_v35, 0.0  ;;  %v487_v41 = vmax.f32 %v485_v37, 0.0  ;;  %v492_v42 = vmax.f32 %v1454_v3, 0.0  ;;  %v981_v44 = vrot.slane %v974_v17, %v972_v15 }
  0x53   : > { %v483_v45 = vsel %vm482_vm9, %v480_v38, %v477_v29  ;;  %v493_v46 = vmax.f32 %v1456_v4, 0.0  ;;  %v502_v50 = vsub.f32 1.0, %v444_v63  ;;  %v1333_v51 = vpop.eup %1332  ;;  %v503_v20 = vsub.f32 1.0, %v445_v6 }
  0x54   : > { %v488_v53 = vadd.f32 %v486_v40, %v474_v36  ;;  %v489_v54 = vadd.f32 %v487_v41, %v483_v45  ;;  %v494_v55 = vadd.f32 %v492_v42, %v474_v36  ;;  %v982_v56 = vcombine.high %v981_v44, %v981_v44 }
  0x55   : > { %v495_v57 = vadd.f32 %v493_v46, %v483_v45  ;;  %v530_v58 = vmul.f32 0.6931472, %v1331_v19  ;;  %v531_v59 = vmul.f32 -0.5, %v1520_v31  ;;  %v534_v3 = vand.u32 2147483647, %v1520_v31 }
  0x56   : > { %v490_v62 = vsub.f32 0.0, %v488_v53  ;;  %v491_v0 = vsub.f32 0.0, %v489_v54  ;;  %v496_v1 = vsub.f32 0.0, %v494_v55  ;;  %988 = vst.msk [vmem:[#allocation2] sm:$0x3] %vm1497_vm2, %v982_v56  ;;  %v540_v5 = vmul.f32 -0.5, %v1523_v18 }
  0x57   : > { %v497_v4 = vsub.f32 0.0, %v495_v57  ;;  %v532_v63 = vadd.f32 1.0, %v531_v59  ;;  %v539_v2 = vmul.f32 0.6931472, %v1333_v51  ;;  %vm535_vm10 = vcmp.lt.f32.partialorder %v534_v3, 0.0004427343 }
  0x58   : > { %v500_v6 = vmul.f32 %v1561_v32, %v490_v62  ;;  %v501_v12 = vmul.f32 %v1568_v39, %v491_v0  ;;  %v504_v15 = vmul.f32 %v502_v50, %v496_v1  ;;  %v541_v27 = vadd.f32 1.0, %v540_v5 }
  0x59   : > { %v505_v22 = vmul.f32 %v503_v20, %v497_v4  ;;  %v533_v26 = vmul.f32 %v1520_v31, %v532_v63  ;;  %v543_v28 = vand.u32 2147483647, %v1523_v18  ;;  %v547_v30 = vsub.f32 0.0, %v1462_v14 }
  0x5a   : > { %v506_v29 = vadd.f32 %v504_v15, %v500_v6  ;;  %v554_v24 = vmax.f32 %v1460_v13, 0.0  ;;  %v542_v17 = vmul.f32 %v1523_v18, %v541_v27  ;;  %v1589_v36 = vmul.f32 %v455_v23, %v448_v9  ;;  %v1247_v15 = vld [vmem:[%s1812_s4 + $0x1] ss:$2 sm:$0x3] }
  0x5b   : > { %v507_v35 = vadd.f32 %v505_v22, %v501_v12  ;;  %v536_v37 = vsel %vm535_vm10, %v533_v26, %v530_v58  ;;  %vm544_vm11 = vcmp.lt.f32.partialorder %v543_v28, 0.0004427343  ;;  %v548_v38 = vmax.f32 %v546_v48, 0.0 }
  0x5c   : > { %v549_v19 = vmax.f32 %v547_v30, 0.0  ;;  %v555_v40 = vmax.f32 %v1462_v14, 0.0  ;;  %v1596_v41 = vmul.f32 %v456_v25, %v449_v10  ;;  %v545_v42 = vsel %vm544_vm11, %v542_v17, %v539_v2 }
  0x5d   : > { %v556_v44 = vadd.f32 %v554_v24, %v536_v37  ;;  %v564_v45 = vsub.f32 1.0, %v448_v9  ;;  %v550_v46 = vadd.f32 %v548_v38, %v536_v37  ;;  %v565_v53 = vsub.f32 1.0, %v449_v10  ;;  %v610_v10 = vld [vmem:[%s1812_s4] ss:$2 sm:$0x3] }
  0x5e   : > { %v551_v50 = vadd.f32 %v549_v19, %v545_v42  ;;  %v557_v51 = vadd.f32 %v555_v40, %v545_v42  ;;  %v508_v0 = vsub.f32 0.0, %v506_v29  ;;  %v509_v1 = vsub.f32 0.0, %v507_v35 }
  0x5f   : > { %v558_v54 = vsub.f32 0.0, %v556_v44  ;;  %v552_v55 = vsub.f32 0.0, %v550_v46  ;;  %v1610_v6 = vrot.slane %v610_v10, %v1504_v52  ;;  %v1613_v12 = vrot.slane %v610_v10, %v1511_v8 }
  0x60   : > { %v553_v20 = vsub.f32 0.0, %v551_v50  ;;  %v559_v56 = vsub.f32 0.0, %v557_v51  ;;  %v1622_v48 = vrot.slane %v1247_v15, %v1504_v52  ;;  %v1625_v30 = vrot.slane %v1247_v15, %v1511_v8 }
  0x61   : > { %v566_v57 = vmul.f32 %v564_v45, %v558_v54  ;;  %v562_v58 = vmul.f32 %v1589_v36, %v552_v55  ;;  %1334 = vrcp.f32 %v1529_v43  ;;  %vm994_vm10 = vcmp.ge.s32.totalorder %v1495_v47, 1 }
  0x62   : > { %v563_v59 = vmul.f32 %v1596_v41, %v553_v20  ;;  %v567_v62 = vmul.f32 %v565_v53, %v559_v56  ;;  %vm995_vm11 = vcmp.le.s32.totalorder %v1495_v47, 6 }
  0x63   : > { %v568_v3 = vadd.f32 %v566_v57, %v562_v58 }
  0x64   : > { %v569_v9 = vadd.f32 %v567_v62, %v563_v59 }
  0x65   : > { %v570_v4 = vsub.f32 0.0, %v568_v3 }
  0x66   : > { %v571_v63 = vsub.f32 0.0, %v569_v9 }
  0x67   : > { %v582_v2 = vadd.f32 %v570_v4, %v508_v0 }
  0x68   : > { %v583_v5 = vadd.f32 %v571_v63, %v509_v1 }
  0x6a   : > { %v1604_v60 = vadd.f32 %v583_v5, %v582_v2  ;;  %v574_v2 = vsel %vm572_vm12, 1.0, %v1520_v31  ;;  %v575_v5 = vsel %vm573_vm13, 1.0, %v1523_v18  ;;  %vm996_vm12 = vmand %vm994_vm10, %vm995_vm11  ;;  %vm1012_vm13 = vcmask 7168  }
  0x6b   : > { %v1335_v9 = vpop.eup %1334  ;;  %vm1038_vm10 = vcmask 113664   ;;  %vm1040_vm11 = vcmask 121856  }
  0x91   : > { %v674_v22 = vpop.permute.xlu0 %673  ;;  %v638_v26 = vpop.permute.xlu1 %637 }
  0x92   : > { %v640_v27 = vsub.f32 %v1610_v6, %v638_v26  ;;  %v641_v28 = vsub.f32 %v1613_v12, %v638_v26  ;;  %v676_v29 = vsub.f32 %v1610_v6, %v674_v22  ;;  %v677_v24 = vsub.f32 %v1613_v12, %v674_v22 }
  0x94   : > { %v642_v35 = vadd.f32 1e-06, %v640_v27  ;;  %v643_v37 = vadd.f32 1e-06, %v641_v28  ;;  %v678_v19 = vadd.f32 1e-06, %v676_v29 }
  0x95   : > { %v679_v45 = vadd.f32 1e-06, %v677_v24 }
  0x96   : > { %v646_v17 = vpop.permute.xlu1 %645  ;;  %v682_v38 = vpop.permute.xlu0 %681  ;;  %v652_v46 = vmul.f32 %v642_v35, %v642_v35  ;;  %v653_v50 = vmul.f32 %v643_v37, %v643_v37  ;;  %v688_v55 = vmul.f32 %v678_v19, %v678_v19  ;;  %v1639_v35 = vmul.f32 %v1335_v9, %v574_v2 }
  0x97   : > { %v648_v40 = vsub.f32 %v1622_v48, %v646_v17  ;;  %v649_v42 = vsub.f32 %v1625_v30, %v646_v17  ;;  %v684_v44 = vsub.f32 %v1622_v48, %v682_v38  ;;  %v685_v52 = vsub.f32 %v1625_v30, %v682_v38 }
  0x98   : > { %v689_v58 = vmul.f32 %v679_v45, %v679_v45 }
  0x99   : > { %v650_v8 = vadd.f32 1e-06, %v648_v40  ;;  %v651_v51 = vadd.f32 1e-06, %v649_v42  ;;  %v686_v53 = vadd.f32 1e-06, %v684_v44 }
  0x9a   : > { %v687_v54 = vadd.f32 1e-06, %v685_v52 }
  0x9b   : > { %v654_v20 = vmul.f32 %v650_v8, %v650_v8  ;;  %v655_v56 = vmul.f32 %v651_v51, %v651_v51  ;;  %v690_v57 = vmul.f32 %v686_v53, %v686_v53 }
  0x9c   : > { %v691_v59 = vmul.f32 %v687_v54, %v687_v54 }
  0x9d   : > { %v656_v62 = vadd.f32 %v654_v20, %v652_v46  ;;  %v657_v0 = vadd.f32 %v655_v56, %v653_v50  ;;  %v692_v1 = vadd.f32 %v690_v57, %v688_v55  ;;  %v1655_v20 = vadd.f32 %v1639_v35, %v1487_v33 }
  0x9e   : > { %v693_v3 = vadd.f32 %v691_v59, %v689_v58  ;;  %v1392_v59 = vmov 0.0  }
  0x9f   : > { %1336 = vrsqrt.f32 %v656_v62  ;;  %vm696_vm14 = vcmp.eq.f32.partialorder %v692_v1, inf  ;;  %vm698_vm15 = vcmp.eq.f32.partialorder %v692_v1, 0.0  ;;  %vm660_vm0 = vcmp.eq.f32.partialorder %v656_v62, inf }
  0xa0   : > { %1338 = vrsqrt.f32 %v657_v0  ;;  %vm667_vm1 = vcmp.eq.f32.partialorder %v657_v0, inf  ;;  %v699_v26 = vand.u32 2147483648, %v692_v1  ;;  %vm703_vm2 = vcmp.eq.f32.partialorder %v693_v3, inf }
  0xa1   : > { %1340 = vrsqrt.f32 %v692_v1  ;;  %v706_v13 = vand.u32 2147483648, %v693_v3  ;;  %vm662_vm3 = vcmp.eq.f32.partialorder %v656_v62, 0.0  ;;  %v663_v28 = vand.u32 2147483648, %v656_v62 }
  0xa2   : > { %1342 = vrsqrt.f32 %v693_v3  ;;  %v670_v29 = vand.u32 2147483648, %v657_v0  ;;  %vm669_vm4 = vcmp.eq.f32.partialorder %v657_v0, 0.0  ;;  %vm705_vm5 = vcmp.eq.f32.partialorder %v693_v3, 0.0 }
  0xa3   : > { %1344 = vrcp.f32 %v1535_v49 }
  0xa9   : > { %v1337_v4 = vpop.eup %1336 }
  0xaa   : > { %v1339_v63 = vpop.eup %1338  ;;  %v659_v10 = vmul.f32 %v1337_v4, %v656_v62 }
  0xab   : > { %v1341_v43 = vpop.eup %1340  ;;  %v666_v15 = vmul.f32 %v1339_v63, %v657_v0 }
  0xac   : > { %v1343_v22 = vpop.eup %1342  ;;  %v695_v49 = vmul.f32 %v1341_v43, %v692_v1  ;;  %v661_v18 = vsel %vm660_vm0, %v656_v62, %v659_v10  ;;  %vm1018_vm0 = vcmask 31744  }
  0xad   : > { %v1345_v14 = vpop.eup %1344  ;;  %v702_v27 = vmul.f32 %v1343_v22, %v693_v3  ;;  %v668_v24 = vsel %vm667_vm1, %v657_v0, %v666_v15  ;;  %v664_v46 = vsel %vm662_vm3, %v663_v28, %v661_v18  ;;  %v587_v22 = vmul.f32 %v1487_v33, %v451_v11 }
  0xae   : > { %v697_v31 = vsel %vm696_vm14, %v692_v1, %v695_v49  ;;  %v1644_v38 = vmul.f32 %v1345_v14, %v575_v5  ;;  %v671_v52 = vsel %vm669_vm4, %v670_v29, %v668_v24  ;;  %vm714_vm6 = vcmp.gt.f32.partialorder %v664_v46, 6.0 }
  0xaf   : > { %v1642_v37 = vsel %vm698_vm15, %v699_v26, %v697_v31  ;;  %v704_v17 = vsel %vm703_vm2, %v693_v3, %v702_v27  ;;  %vm715_vm7 = vcmp.gt.f32.partialorder %v671_v52, 6.0  ;;  %v1662_v62 = vsel %vm714_vm6, 1.0, %v1392_v59 }
  0xb0   : > { %v1646_v19 = vsel %vm705_vm5, %v706_v13, %v704_v17  ;;  %v809_v40 = vmul.f32 0.16666667, %v1642_v37  ;;  %v801_v42 = vmul.f32 0.33333334, %v1642_v37  ;;  %v1659_v56 = vadd.f32 %v1644_v38, %v1489_v34 }
  0xb1   : > { %v810_v44 = vmul.f32 0.16666667, %v1646_v19  ;;  %v802_v45 = vmul.f32 0.33333334, %v1646_v19  ;;  %v1665_v0 = vsel %vm715_vm7, 1.0, %v1392_v59  ;;  %v1669_v1 = vmul.f32 %v1662_v62, %v1655_v20 }
  0xb2   : > { %v811_v50 = vsub.f32 1.0, %v809_v40  ;;  %v803_v8 = vsub.f32 1.0, %v801_v42  ;;  %v1673_v3 = vmul.f32 %v1665_v0, %v1659_v56  ;;  %v728_v43 = vmul.f32 0.33333334, %v664_v46 }
  0xb3   : > { %v812_v51 = vsub.f32 1.0, %v810_v44  ;;  %v804_v53 = vsub.f32 1.0, %v802_v45  ;;  %v826_v9 = vmul.f32 %v1669_v1, %v1622_v48  ;;  %v821_v63 = vmul.f32 %v1669_v1, %v1610_v6 }
  0xb4   : > { %v813_v54 = vmul.f32 1.442695, %v811_v50  ;;  %v805_v55 = vmul.f32 1.442695, %v803_v8  ;;  %v827_v4 = vmul.f32 %v1673_v3, %v1625_v30  ;;  %v822_v2 = vmul.f32 %v1673_v3, %v1613_v12 }
  0xb5   : > { %v815_v57 = vmul.f32 1.442695, %v812_v51  ;;  %v807_v58 = vmul.f32 1.442695, %v804_v53  ;;  %v729_v15 = vmul.f32 0.33333334, %v671_v52  ;;  %v589_v49 = vmul.f32 %v1639_v35, %v455_v23 }
  0xb6   : > { %1346 = vpow2.f32 %v813_v54  ;;  %v1683_v5 = vadd.f32 %v827_v4, %v826_v9  ;;  %v1685_v10 = vadd.f32 %v822_v2, %v821_v63  ;;  %v724_v13 = vsub.f32 1.0, %v1639_v35 }
  0xb7   : > { %1348 = vpow2.f32 %v815_v57  ;;  %v725_v14 = vsub.f32 1.0, %v1644_v38  ;;  %v730_v27 = vsub.f32 1.0, %v728_v43  ;;  %v736_v28 = vmul.f32 0.16666667, %v664_v46 }
  0xb8   : > { %1350 = vpow2.f32 %v805_v55  ;;  %v722_v18 = vsub.f32 1.0, %v1487_v33  ;;  %v731_v24 = vsub.f32 1.0, %v729_v15  ;;  %v737_v17 = vmul.f32 0.16666667, %v671_v52 }
  0xb9   : > { %1352 = vpow2.f32 %v807_v58  ;;  %v723_v42 = vsub.f32 1.0, %v1489_v34  ;;  %v588_v23 = vmul.f32 %v1489_v34, %v452_v21  ;;  %v590_v44 = vmul.f32 %v1644_v38, %v456_v25 }
  0xba   : > { %v591_v52 = vmul.f32 %v587_v22, %v1561_v32  ;;  %v593_v8 = vmul.f32 %v589_v49, %v1589_v36  ;;  %v732_v61 = vmul.f32 1.442695, %v730_v27  ;;  %v738_v54 = vsub.f32 1.0, %v736_v28 }
  0xbb   : > { %v734_v25 = vmul.f32 1.442695, %v731_v24  ;;  %v739_v55 = vsub.f32 1.0, %v737_v17  ;;  %v592_v9 = vmul.f32 %v588_v23, %v1568_v39  ;;  %v594_v4 = vmul.f32 %v590_v44, %v1596_v41 }
  0xbc   : > { %1354 = vpow2.f32 %v732_v61  ;;  %v740_v15 = vmul.f32 1.442695, %v738_v54  ;;  %v595_v27 = vadd.f32 %v593_v8, %v591_v52  ;;  %vm708_vm8 = vcmp.gt.f32.partialorder %v1642_v37, 6.0 }
  0xbd   : > { %1356 = vpow2.f32 %v734_v25  ;;  %v742_v28 = vmul.f32 1.442695, %v739_v55  ;;  %v596_v24 = vadd.f32 %v594_v4, %v592_v9  ;;  %vm709_vm9 = vcmp.gt.f32.partialorder %v1646_v19, 6.0 }
  0xbe   : > { %1358 = vpow2.f32 %v740_v15  ;;  %v1732_v17 = vsel %vm708_vm8, 1.0, %v1392_v59  ;;  %v606_v52 = vadd.f32 %v1596_v41, %v1568_v39  ;;  %v600_v37 = vadd.f32 %v589_v49, %v587_v22 }
  0xbf   : > { %1360 = vpow2.f32 %v742_v28  ;;  %v601_v19 = vadd.f32 %v590_v44, %v588_v23  ;;  %v726_v8 = vmul.f32 %v1732_v17, %v1655_v20  ;;  %vm1014_vm14 = vcmask 15360  }
  0xc0   : > { %v1347_v26 = vpop.eup %1346  ;;  %vm1016_vm15 = vcmask 23552   ;;  %vm1020_vm1 = vcmask 39936   ;;  %vm1022_vm2 = vcmask 48128   ;;  %vm1024_vm3 = vcmask 56320  }
  0xc1   : > { %v1349_v29 = vpop.eup %1348  ;;  %v1695_v31 = vadd.f32 -1.0, %v1347_v26  ;;  %v875_v26 = vadd.f32 %v1644_v38, %v1639_v35  ;;  %vm1026_vm4 = vcmask 64512   ;;  %vm1028_vm5 = vcmask 72704  }
  0xc2   : > { %v1351_v40 = vpop.eup %1350  ;;  %v1698_v11 = vadd.f32 -1.0, %v1349_v29  ;;  %vm1030_vm6 = vcmask 80896   ;;  %vm1032_vm7 = vcmask 89088   ;;  %vm1034_vm8 = vcmask 97280  }
  0xc3   : > { %v1353_v45 = vpop.eup %1352  ;;  %v865_v46 = vmax.f32 %v1695_v31, 0.0  ;;  %v1708_v50 = vadd.f32 -1.0, %v1351_v40  ;;  %v1735_v40 = vsel %vm709_vm9, 1.0, %v1392_v59  ;;  %vm1036_vm9 = vcmask 105472  }
  0xc4   : > { %v866_v51 = vmax.f32 %v1698_v11, 0.0  ;;  %v1713_v53 = vadd.f32 -1.0, %v1353_v45  ;;  %v597_v45 = vadd.f32 %v596_v24, %v595_v27  ;;  %v847_v9 = vsub.f32 0.0, %v1698_v11 }
  0xc5   : > { %v867_v7 = vmul.f32 %v865_v46, %v724_v13  ;;  %v858_v21 = vmax.f32 %v1708_v50, 0.0  ;;  %v605_v46 = vadd.f32 %v1589_v36, %v1561_v32  ;;  %v602_v32 = vadd.f32 %v601_v19, %v600_v37 }
  0xc6   : > { %v868_v57 = vmul.f32 %v866_v51, %v725_v14  ;;  %v859_v58 = vmax.f32 %v1713_v53, 0.0  ;;  %v727_v51 = vmul.f32 %v1735_v40, %v1659_v56  ;;  %v1355_v61 = vpop.eup %1354  ;;  %v753_v36 = vmul.f32 %v726_v8, %v1622_v48 }
  0xc7   : > { %v860_v63 = vmul.f32 %v858_v21, %v722_v18  ;;  %v607_v54 = vadd.f32 %v606_v52, %v605_v46  ;;  %v1252_v22 = vadd.f32 -1.0, %v1355_v61  ;;  %v834_v44 = vsub.f32 0.0, %v1708_v50 }
  0xc8   : > { %v869_v2 = vadd.f32 %v868_v57, %v867_v7  ;;  %v861_v43 = vmul.f32 %v859_v58, %v723_v42  ;;  %v1357_v7 = vpop.eup %1356  ;;  %v754_v39 = vmul.f32 %v727_v51, %v1625_v30  ;;  %v749_v41 = vmul.f32 %v727_v51, %v1613_v12 }
  0xc9   : > { %v1359_v20 = vpop.eup %1358  ;;  %v1253_v49 = vadd.f32 -1.0, %v1357_v7  ;;  %v785_v25 = vmax.f32 %v1252_v22, 0.0  ;;  %v761_v48 = vsub.f32 0.0, %v1252_v22  ;;  %v758_v12 = vadd.f32 %v727_v51, %v726_v8 }
  0xca   : > { %870 = vadd.xlane.f32.xlu0 %v869_v2  ;;  %v862_v29 = vadd.f32 %v861_v43, %v860_v63  ;;  %v1361_v56 = vpop.eup %1360  ;;  %v755_v23 = vadd.f32 %v754_v39, %v753_v36  ;;  %v1254_v55 = vadd.f32 -1.0, %v1359_v20  ;;  %v846_v58 = vsub.f32 0.0, %v1695_v31 }
  0xcb   : > { %v786_v30 = vmax.f32 %v1253_v49, 0.0  ;;  %v762_v57 = vsub.f32 0.0, %v1253_v49  ;;  %v836_v2 = vmax.f32 %v834_v44, 0.0  ;;  %v763_v43 = vmax.f32 %v761_v48, 0.0 }
  0xcc   : > { %863 = vadd.xlane.f32.xlu1 %v862_v29  ;;  %v792_v4 = vmax.f32 %v1254_v55, 0.0  ;;  %v773_v27 = vsub.f32 0.0, %v1254_v55  ;;  %v831_v31 = vadd.f32 %v1673_v3, %v1669_v1  ;;  %v848_v11 = vmax.f32 %v846_v58, 0.0 }
  0xcd   : > { %v788_v15 = vmul.f32 %v786_v30, %v723_v42  ;;  %v849_v29 = vmax.f32 %v847_v9, 0.0  ;;  %v765_v46 = vmul.f32 %v1732_v17, %v763_v43 }
  0xce   : > { %876 = vadd.xlane.f32.xlu0 %v875_v26  ;;  %v764_v26 = vmax.f32 %v762_v57, 0.0  ;;  %v794_v24 = vmul.f32 %v792_v4, %v724_v13  ;;  %v775_v3 = vmax.f32 %v773_v27, 0.0 }
  0xcf   : > { %v767_v51 = vmul.f32 %v765_v46, %v1487_v33 }
  0xd0   : > { %1009 = vadd.xlane.f32.xlu1 %v1551_v16  ;;  %v748_v16 = vmul.f32 %v726_v8, %v1610_v6  ;;  %v1255_v6 = vadd.f32 -1.0, %v1361_v56  ;;  %v766_v1 = vmul.f32 %v1735_v40, %v764_v26  ;;  %v851_v8 = vmul.f32 %v1665_v0, %v849_v29 }
  0xd1   : > { %v777_v61 = vmul.f32 %v1732_v17, %v775_v3  ;;  %v874_v17 = vpop.xlane.xlu0 %873 }
  0xd2   : > { %598 = vadd.xlane.f32.xlu0 %v597_v45  ;;  %v750_v21 = vadd.f32 %v749_v41, %v748_v16  ;;  %v793_v63 = vmax.f32 %v1255_v6, 0.0  ;;  %v774_v28 = vsub.f32 0.0, %v1255_v6  ;;  %v838_v45 = vmul.f32 %v1662_v62, %v836_v2 }
  0xd3   : > { %v779_v39 = vmul.f32 %v777_v61, %v1639_v35  ;;  %v1260_v16 = vsel %vm996_vm12, 1.0, %v1392_v59  ;;  %vm1051_vm12 = vcmask 130048  }
  0xd4   : > { %585 = vadd.xlane.f32.xlu1 %v1604_v60  ;;  %v835_v60 = vsub.f32 0.0, %v1713_v53  ;;  %v787_v53 = vmul.f32 %v785_v25, %v722_v18  ;;  %v795_v18 = vmul.f32 %v793_v63, %v725_v14  ;;  %v776_v37 = vmax.f32 %v774_v28, 0.0 }
  0xd5   : > { %v840_v19 = vmul.f32 %v838_v45, %v1487_v33 }
  0xd6   : > { %608 = vadd.xlane.f32.xlu0 %v607_v54  ;;  %v837_v50 = vmax.f32 %v835_v60, 0.0  ;;  %v789_v52 = vadd.f32 %v788_v15, %v787_v53  ;;  %v796_v13 = vadd.f32 %v795_v18, %v794_v24  ;;  %v778_v54 = vmul.f32 %v1735_v40, %v776_v37 }
  0xd8   : > { %603 = vadd.xlane.f32.xlu1 %v602_v32  ;;  %v839_v42 = vmul.f32 %v1665_v0, %v837_v50  ;;  %v853_v32 = vmul.f32 %v851_v8, %v1644_v38  ;;  %v780_v0 = vmul.f32 %v778_v54, %v1644_v38  ;;  %v999_v38 = vmul.f32 -2.0, %v1260_v16 }
  0xda   : > { %756 = vadd.xlane.f32.xlu0 %v755_v23  ;;  %v841_v14 = vmul.f32 %v839_v42, %v1489_v34 }
  0xdc   : > { %751 = vadd.xlane.f32.xlu1 %v750_v21  ;;  %v842_v7 = vadd.f32 %v841_v14, %v840_v19 }
  0xde   : > { %759 = vadd.xlane.f32.xlu0 %v758_v12 }
  0xe0   : > { %829 = vadd.xlane.f32.xlu1 %v1683_v5  ;;  %v850_v5 = vmul.f32 %v1662_v62, %v848_v11 }
  0xe2   : > { %824 = vadd.xlane.f32.xlu0 %v1685_v10  ;;  %v768_v10 = vmul.f32 %v766_v1, %v1489_v34  ;;  %v852_v62 = vmul.f32 %v850_v5, %v1639_v35  ;;  %v781_v34 = vadd.f32 %v780_v0, %v779_v39 }
  0xe4   : > { %832 = vadd.xlane.f32.xlu1 %v831_v31  ;;  %v769_v36 = vadd.f32 %v768_v10, %v767_v51  ;;  %v854_v33 = vadd.f32 %v853_v32, %v852_v62 }
  0xe6   : > { %790 = vadd.xlane.f32.xlu0 %v789_v52 }
  0xe8   : > { %797 = vadd.xlane.f32.xlu1 %v796_v13 }
  0xea   : > { %843 = vadd.xlane.f32.xlu0 %v842_v7 }
  0xec   : > { %770 = vadd.xlane.f32.xlu1 %v769_v36 }
  0xee   : > { %855 = vadd.xlane.f32.xlu0 %v854_v33 }
  0xf0   : > { %782 = vadd.xlane.f32.xlu1 %v781_v34 }
 0x157   : > { %v871_v40 = vpop.xlane.xlu0 %870 }
 0x159   : > { %v864_v41 = vpop.xlane.xlu1 %863 }
 0x15a   : > { %v1042_v35 = vsel %vm1012_vm13, %v864_v41, %v871_v40 }
 0x15b   : > { %v877_v22 = vpop.xlane.xlu0 %876  ;;  %v1043_v20 = vsel %vm1014_vm14, %v1042_v35, %v874_v17 }
 0x15c   : > { %v1044_v49 = vsel %vm1016_vm15, %v1043_v20, %v877_v22 }
 0x15d   : > { %v1010_v56 = vpop.xlane.xlu1 %1009 }
 0x15e   : > { %v1011_v23 = vmul.f32 %v1010_v56, %v999_v38 }
 0x15f   : > { %v599_v47 = vpop.xlane.xlu0 %598 }
 0x160   : > { %v1045_v44 = vsel %vm1018_vm0, %v1044_v49, %v1011_v23 }
 0x161   : > { %v586_v60 = vpop.xlane.xlu1 %585  ;;  %v1046_v59 = vsel %vm1020_vm1, %v1045_v44, 0.0 }
 0x162   : > { %1048 = vrot.lane.b32.xlu1 %v1046_v59, %s1393_s16  ;;  %v1013_v21 = vsel %vm1012_vm13, %v586_v60, %v599_v47 }
 0x163   : > { %v609_v25 = vpop.xlane.xlu0 %608 }
 0x165   : > { %v604_v48 = vpop.xlane.xlu1 %603 }
 0x166   : > { %v1015_v30 = vsel %vm1014_vm14, %v1013_v21, %v604_v48 }
 0x167   : > { %v1017_v55 = vsel %vm1016_vm15, %v1015_v30, %v609_v25  ;;  %v757_v6 = vpop.xlane.xlu0 %756 }
 0x169   : > { %v752_v57 = vpop.xlane.xlu1 %751 }
 0x16a   : > { %v1019_v12 = vsel %vm1018_vm0, %v1017_v55, %v752_v57 }
 0x16b   : > { %v1021_v58 = vsel %vm1020_vm1, %v1019_v12, %v757_v6  ;;  %v760_v50 = vpop.xlane.xlu0 %759 }
 0x16c   : > { %v1023_v27 = vsel %vm1022_vm2, %v1021_v58, %v760_v50 }
 0x16d   : > { %v830_v9 = vpop.xlane.xlu1 %829 }
 0x16f   : > { %v825_v15 = vpop.xlane.xlu0 %824 }
 0x171   : > { %v833_v4 = vpop.xlane.xlu1 %832 }
 0x173   : > { %v791_v11 = vpop.xlane.xlu0 %790 }
 0x175   : > { %v798_v63 = vpop.xlane.xlu1 %797 }
 0x177   : > { %v844_v45 = vpop.xlane.xlu0 %843 }
 0x178   : > { %v845_v52 = vmul.f32 0.2, %v844_v45 }
 0x179   : > { %v771_v2 = vpop.xlane.xlu1 %770 }
 0x17a   : > { %v772_v43 = vmul.f32 0.2, %v771_v2 }
 0x17b   : > { %v856_v1 = vpop.xlane.xlu0 %855 }
 0x17c   : > { %v1025_v28 = vsel %vm1024_vm3, %v1023_v27, %v772_v43  ;;  %v857_v37 = vmul.f32 0.2, %v856_v1 }
 0x17d   : > { %v783_v53 = vpop.xlane.xlu1 %782 }
 0x17e   : > { %v784_v26 = vmul.f32 0.2, %v783_v53 }
 0x180   : > { %v1027_v31 = vsel %vm1026_vm4, %v1025_v28, %v784_v26 }
 0x181   : > { %v1029_v29 = vsel %vm1028_vm5, %v1027_v31, %v791_v11 }
 0x182   : > { %v1031_v24 = vsel %vm1030_vm6, %v1029_v29, %v798_v63 }
 0x183   : > { %v1033_v18 = vsel %vm1032_vm7, %v1031_v24, %v825_v15 }
 0x184   : > { %v1035_v42 = vsel %vm1034_vm8, %v1033_v18, %v830_v9 }
 0x185   : > { %v1037_v46 = vsel %vm1036_vm9, %v1035_v42, %v833_v4 }
 0x186   : > { %v1039_v3 = vsel %vm1038_vm10, %v1037_v46, %v845_v52 }
 0x187   : > { %v1041_v5 = vsel %vm1040_vm11, %v1039_v3, %v857_v37 }
 0x1d4   : > { %v1049_v13 = vpop.permute.xlu1 %1048 }
 0x1d5   : > { %v1052_v19 = vsel %vm1051_vm12, %v1041_v5, %v1049_v13 }
 0x1d6   : > { %1053 = vst [vmem:[%s437_s24] sm:$0xff] %v1052_v19 }
 0x1d7 PF: > { %s15_s20 = sadd.s32 1, %s1384_s20   ;;  %s1816_s18 = smov %s1380_s19 }
 0x1d8   : > { %p12_p5 = scmp.ge.s32.totalorder %s15_s20, 4   ;;  %s1817_s19 = smov %s1819_s21 }
 0x1da   :  { %14 = sbr.rel (!%p12_p5) target bundleno = 2 (0x2), region = 90 }

</bundles_post_ra>
